<compile_context>
chip_gen: v6e
topology: v6e:2x2x1
jax: 0.10.0
libtpu: 0.0.40
codegen_flags: <defaults>
</compile_context>

<pallas_src>
import jax
import jax.numpy as jnp
from jax import lax
from jax.experimental import pallas as pl
from jax.experimental.pallas import tpu as pltpu

B = 2            # batch
L = 16           # sequence length (Conv1d spatial dim)
WIDTH = 64       # block width (channels)
ONBOARD = 16     # onboard_width (extra input channels merged in block 0)
LENGTH = 4       # number of blocks
TOKENS = B * L   # rows of every matmul


def _world_rollout_kernel(x_ref, last_init_ref, wx_ref, ws_ref, b_ref,
                          out_ref, state_out_ref):
    """Whole-rollout kernel: T recurrent CircularWorld.forward steps.

    x_ref         : (T, TOKENS, ONBOARD) f32  -- onboard inputs for all steps
    last_init_ref : (TOKENS, WIDTH)      f32  -- last_end entering the rollout
    wx_ref        : (ONBOARD, WIDTH)     f32  -- block-0 weight rows for x_t
    ws_ref        : (LENGTH, WIDTH, WIDTH) f32
                    ws[0] = block-0 weight rows for last_end, ws[k] = block k
    b_ref         : (LENGTH, WIDTH)      f32  -- per-block biases
    out_ref       : (T, TOKENS, WIDTH)   f32  -- per-step outputs
    state_out_ref : (TOKENS, WIDTH)      f32  -- post-rollout last_end
    """
    num_steps = x_ref.shape[0]

    # Hoist weight loads and bias broadcasts out of the (unrolled) time loop.
    wx = wx_ref[...]
    ws = [ws_ref[k] for k in range(LENGTH)]
    bias = [jnp.broadcast_to(b_ref[k:k + 1, :], (TOKENS, WIDTH))
            for k in range(LENGTH)]

    def step(t, state):
        # block 0: concat([x, last_end]) @ W0  ==  x @ W0a + last_end @ W0b
        h = (jnp.dot(x_ref[t], wx, preferred_element_type=jnp.float32)
             + jnp.dot(state, ws[0], preferred_element_type=jnp.float32)
             + bias[0])
        h = jnp.maximum(h, 0.0)
        # blocks 1..LENGTH-1: pointwise conv + ReLU
        for k in range(1, LENGTH):
            h = jnp.maximum(
                jnp.dot(h, ws[k], preferred_element_type=jnp.float32) + bias[k],
                0.0)
        out_ref[t] = h
        return h           # self.last_end = output (detached), carried in vregs

    final_state = lax.fori_loop(0, num_steps, step, last_init_ref[...],
                                unroll=True)
    state_out_ref[...] = final_state


@jax.jit
def circular_world_rollout_tm(x_tm, last_tm, params):
    """Fused T-step rollout, token-major in and out.

    x_tm    : (T, TOKENS, ONBOARD)
    last_tm : (TOKENS, WIDTH)
    returns : (outs_tm (T, TOKENS, WIDTH), new_last_tm (TOKENS, WIDTH))
    """
    wx, ws, biases = params
    T = x_tm.shape[0]

    outs_tm, new_last_tm = pl.pallas_call(
        _world_rollout_kernel,
        out_shape=(jax.ShapeDtypeStruct((T, TOKENS, WIDTH), jnp.float32),
                   jax.ShapeDtypeStruct((TOKENS, WIDTH), jnp.float32)),
        grid=(1,),                                   # single invocation
        in_specs=[
            pl.BlockSpec((T, TOKENS, ONBOARD), lambda i: (0, 0, 0)),
            pl.BlockSpec((TOKENS, WIDTH), lambda i: (0, 0)),
            pl.BlockSpec((ONBOARD, WIDTH), lambda i: (0, 0)),
            pl.BlockSpec((LENGTH, WIDTH, WIDTH), lambda i: (0, 0, 0)),
            pl.BlockSpec((LENGTH, WIDTH), lambda i: (0, 0)),
        ],
        out_specs=(pl.BlockSpec((T, TOKENS, WIDTH), lambda i: (0, 0, 0)),
                   pl.BlockSpec((TOKENS, WIDTH), lambda i: (0, 0))),
        compiler_params=pltpu.CompilerParams(
            dimension_semantics=("arbitrary",)),
    )(x_tm, last_tm, wx, ws, biases)
    return outs_tm, new_last_tm


# ---- NCL <-> token-major boundary conversions (done once per model call) ----

def x_seq_ncl_to_tm(x_seq):          # (T, B, ONBOARD, L) -> (T, B*L, ONBOARD)
    T = x_seq.shape[0]
    return jnp.transpose(x_seq, (0, 1, 3, 2)).reshape(T, TOKENS, ONBOARD)


def state_ncl_to_tm(s):              # (B, WIDTH, L) -> (B*L, WIDTH)
    return jnp.transpose(s, (0, 2, 1)).reshape(TOKENS, WIDTH)


def outs_tm_to_ncl(o_tm):            # (T, B*L, WIDTH) -> (T, B, WIDTH, L)
    T = o_tm.shape[0]
    return jnp.transpose(o_tm.reshape(T, B, L, WIDTH), (0, 1, 3, 2))


def state_tm_to_ncl(s_tm):           # (B*L, WIDTH) -> (B, WIDTH, L)
    return jnp.transpose(s_tm.reshape(B, L, WIDTH), (0, 2, 1))


def init_params(key):
    """Deterministic Conv1d(k=1) weights, packed into 3 arrays."""
    keys = jax.random.split(key, 6)
    scale0 = 1.0 / jnp.sqrt(jnp.float32(WIDTH + ONBOARD))
    scale = 1.0 / jnp.sqrt(jnp.float32(WIDTH))
    wx = jax.random.normal(keys[0], (ONBOARD, WIDTH), jnp.float32) * scale0
    w0b = jax.random.normal(keys[1], (WIDTH, WIDTH), jnp.float32) * scale0
    w_rest = [jax.random.normal(keys[2 + k], (WIDTH, WIDTH), jnp.float32) * scale
              for k in range(LENGTH - 1)]
    ws = jnp.stack([w0b] + w_rest, axis=0)                    # (LENGTH, 64, 64)
    biases = jax.random.normal(keys[5], (LENGTH, WIDTH), jnp.float32) * 0.01
    return (wx, ws, biases)


def _reference_rollout_tm(x_tm, last_tm, params):
    """Pure-JAX reference of the same math (step-by-step recurrence)."""
    wx, ws, biases = params
    T = x_tm.shape[0]
    last = last_tm
    outs = []
    for t in range(T):
        h = jnp.maximum(x_tm[t] @ wx + last @ ws[0] + biases[0:1, :], 0.0)
        for k in range(1, LENGTH):
            h = jnp.maximum(h @ ws[k] + biases[k:k + 1, :], 0.0)
        last = h
        outs.append(h)
    return jnp.stack(outs, axis=0), last


if __name__ == "__main__":
    key = jax.random.PRNGKey(0)
    k_params, k_x = jax.random.split(key)
    params = init_params(k_params)

    T = 8  # timesteps fused into a single pallas_call
    x_seq = jax.random.normal(k_x, (T, B, ONBOARD, L), jnp.float32)
    last0 = jnp.zeros((B, WIDTH, L), jnp.float32)   # torch.zeros(2, 64, 16)

    # Convert once at the model boundary; chained rollouts stay token-major.
    x_tm = x_seq_ncl_to_tm(x_seq)
    last_tm0 = state_ncl_to_tm(last0)

    outs1_tm, state1_tm = circular_world_rollout_tm(x_tm, last_tm0, params)
    outs2_tm, state2_tm = circular_world_rollout_tm(x_tm, state1_tm, params)
    jax.block_until_ready((outs1_tm, state1_tm, outs2_tm, state2_tm))

    # Sanity check against the pure-JAX reference.
    ref1_tm, rstate1_tm = _reference_rollout_tm(x_tm, last_tm0, params)
    ref2_tm, _ = _reference_rollout_tm(x_tm, rstate1_tm, params)

    outs1_ncl = outs_tm_to_ncl(outs1_tm)
    state2_ncl = state_tm_to_ncl(state2_tm)
    assert outs1_ncl.shape == (T, B, WIDTH, L)
    assert state2_ncl.shape == (B, WIDTH, L)
    assert jnp.allclose(outs1_tm, ref1_tm, atol=1e-3, rtol=1e-3)
    assert jnp.allclose(state1_tm, ref1_tm[-1], atol=1e-3, rtol=1e-3)
    assert jnp.allclose(outs2_tm, ref2_tm, atol=1e-3, rtol=1e-3)
    assert jnp.allclose(state2_tm, ref2_tm[-1], atol=1e-3, rtol=1e-3)

    # TODO(synk): `block_factory` / `eval_no_grad` are unspecified in the source
    # module; blocks are concretized here as pointwise Conv1d(k=1)+ReLU.
    print("KERNEL_OK")
</pallas_src>

<mosaic_0001>
module attributes {stable_mosaic.version = 11 : i64} {
  func.func @_world_rollout_kernel(%arg0: i32, %arg1: memref<8x32x16xf32, #tpu.memory_space<vmem>>, %arg2: memref<32x64xf32, #tpu.memory_space<vmem>>, %arg3: memref<16x64xf32, #tpu.memory_space<vmem>>, %arg4: memref<4x64x64xf32, #tpu.memory_space<vmem>>, %arg5: memref<4x64xf32, #tpu.memory_space<vmem>>, %arg6: memref<8x32x64xf32, #tpu.memory_space<vmem>>, %arg7: memref<32x64xf32, #tpu.memory_space<vmem>>) attributes {dimension_semantics = [#tpu.dimension_semantics<arbitrary>], iteration_bounds = array<i64: 1>, scalar_prefetch = 0 : i64, scratch_operands = 0 : i64, tpu.core_type = #tpu.core_type<tc>, window_params = [{pipeline_mode = #tpu.pipeline_mode<synchronous>, transform_indices = @transform_0, window_bounds = array<i64: 8, 32, 16>}, {pipeline_mode = #tpu.pipeline_mode<synchronous>, transform_indices = @transform_1, window_bounds = array<i64: 32, 64>}, {pipeline_mode = #tpu.pipeline_mode<synchronous>, transform_indices = @transform_2, window_bounds = array<i64: 16, 64>}, {pipeline_mode = #tpu.pipeline_mode<synchronous>, transform_indices = @transform_3, window_bounds = array<i64: 4, 64, 64>}, {pipeline_mode = #tpu.pipeline_mode<synchronous>, transform_indices = @transform_4, window_bounds = array<i64: 4, 64>}, {pipeline_mode = #tpu.pipeline_mode<synchronous>, transform_indices = @transform_5, window_bounds = array<i64: 8, 32, 64>}, {pipeline_mode = #tpu.pipeline_mode<synchronous>, transform_indices = @transform_6, window_bounds = array<i64: 32, 64>}]} {
    %c0 = arith.constant 0 : index
    %c0_0 = arith.constant 0 : index
    %0 = vector.load %arg3[%c0, %c0_0] : memref<16x64xf32, #tpu.memory_space<vmem>>, vector<16x64xf32>
    %c0_1 = arith.constant 0 : index
    %c0_2 = arith.constant 0 : index
    %c0_3 = arith.constant 0 : index
    %1 = vector.load %arg4[%c0_1, %c0_2, %c0_3] : memref<4x64x64xf32, #tpu.memory_space<vmem>>, vector<1x64x64xf32>
    %2 = vector.shape_cast %1 : vector<1x64x64xf32> to vector<64x64xf32>
    %c1 = arith.constant 1 : index
    %c0_4 = arith.constant 0 : index
    %c0_5 = arith.constant 0 : index
    %3 = vector.load %arg4[%c1, %c0_4, %c0_5] : memref<4x64x64xf32, #tpu.memory_space<vmem>>, vector<1x64x64xf32>
    %4 = vector.shape_cast %3 : vector<1x64x64xf32> to vector<64x64xf32>
    %c2 = arith.constant 2 : index
    %c0_6 = arith.constant 0 : index
    %c0_7 = arith.constant 0 : index
    %5 = vector.load %arg4[%c2, %c0_6, %c0_7] : memref<4x64x64xf32, #tpu.memory_space<vmem>>, vector<1x64x64xf32>
    %6 = vector.shape_cast %5 : vector<1x64x64xf32> to vector<64x64xf32>
    %c3 = arith.constant 3 : index
    %c0_8 = arith.constant 0 : index
    %c0_9 = arith.constant 0 : index
    %7 = vector.load %arg4[%c3, %c0_8, %c0_9] : memref<4x64x64xf32, #tpu.memory_space<vmem>>, vector<1x64x64xf32>
    %8 = vector.shape_cast %7 : vector<1x64x64xf32> to vector<64x64xf32>
    %c0_10 = arith.constant 0 : index
    %c0_11 = arith.constant 0 : index
    %9 = vector.load %arg5[%c0_10, %c0_11] : memref<4x64xf32, #tpu.memory_space<vmem>>, vector<1x64xf32>
    %10 = vector.shape_cast %9 : vector<1x64xf32> to vector<1x64xf32>
    %11 = vector.broadcast %10 : vector<1x64xf32> to vector<32x64xf32>
    %c1_12 = arith.constant 1 : index
    %c0_13 = arith.constant 0 : index
    %12 = vector.load %arg5[%c1_12, %c0_13] : memref<4x64xf32, #tpu.memory_space<vmem>>, vector<1x64xf32>
    %13 = vector.shape_cast %12 : vector<1x64xf32> to vector<1x64xf32>
    %14 = vector.broadcast %13 : vector<1x64xf32> to vector<32x64xf32>
    %c2_14 = arith.constant 2 : index
    %c0_15 = arith.constant 0 : index
    %15 = vector.load %arg5[%c2_14, %c0_15] : memref<4x64xf32, #tpu.memory_space<vmem>>, vector<1x64xf32>
    %16 = vector.shape_cast %15 : vector<1x64xf32> to vector<1x64xf32>
    %17 = vector.broadcast %16 : vector<1x64xf32> to vector<32x64xf32>
    %c3_16 = arith.constant 3 : index
    %c0_17 = arith.constant 0 : index
    %18 = vector.load %arg5[%c3_16, %c0_17] : memref<4x64xf32, #tpu.memory_space<vmem>>, vector<1x64xf32>
    %19 = vector.shape_cast %18 : vector<1x64xf32> to vector<1x64xf32>
    %20 = vector.broadcast %19 : vector<1x64xf32> to vector<32x64xf32>
    %c0_18 = arith.constant 0 : index
    %c0_19 = arith.constant 0 : index
    %21 = vector.load %arg2[%c0_18, %c0_19] : memref<32x64xf32, #tpu.memory_space<vmem>>, vector<32x64xf32>
    %c0_i32 = arith.constant 0 : i32
    %22 = arith.index_cast %c0_i32 : i32 to index
    %c0_20 = arith.constant 0 : index
    %c0_21 = arith.constant 0 : index
    %23 = vector.load %arg1[%22, %c0_20, %c0_21] : memref<8x32x16xf32, #tpu.memory_space<vmem>>, vector<1x32x16xf32>
    %24 = vector.shape_cast %23 : vector<1x32x16xf32> to vector<32x16xf32>
    %cst = arith.constant dense<0.000000e+00> : vector<32x64xf32>
    %25 = tpu.matmul %24, %0, %cst {dimension_numbers = #tpu.dot_dimension_numbers<[1], [0], [0], [1], [0, 0, 1, 1], [], []>} : vector<32x16xf32>, vector<16x64xf32>, vector<32x64xf32> -> vector<32x64xf32>
    %cst_22 = arith.constant dense<0.000000e+00> : vector<32x64xf32>
    %26 = tpu.matmul %21, %2, %cst_22 {dimension_numbers = #tpu.dot_dimension_numbers<[1], [0], [0], [1], [0, 0, 1, 1], [], []>} : vector<32x64xf32>, vector<64x64xf32>, vector<32x64xf32> -> vector<32x64xf32>
    %27 = arith.addf %25, %26 : vector<32x64xf32>
    %28 = arith.addf %27, %11 : vector<32x64xf32>
    %cst_23 = arith.constant 0.000000e+00 : f32
    %29 = vector.broadcast %cst_23 : f32 to vector<32x64xf32>
    %30 = arith.maximumf %28, %29 : vector<32x64xf32>
    %cst_24 = arith.constant dense<0.000000e+00> : vector<32x64xf32>
    %31 = tpu.matmul %30, %4, %cst_24 {dimension_numbers = #tpu.dot_dimension_numbers<[1], [0], [0], [1], [0, 0, 1, 1], [], []>} : vector<32x64xf32>, vector<64x64xf32>, vector<32x64xf32> -> vector<32x64xf32>
    %32 = arith.addf %31, %14 : vector<32x64xf32>
    %cst_25 = arith.constant 0.000000e+00 : f32
    %33 = vector.broadcast %cst_25 : f32 to vector<32x64xf32>
    %34 = arith.maximumf %32, %33 : vector<32x64xf32>
    %cst_26 = arith.constant dense<0.000000e+00> : vector<32x64xf32>
    %35 = tpu.matmul %34, %6, %cst_26 {dimension_numbers = #tpu.dot_dimension_numbers<[1], [0], [0], [1], [0, 0, 1, 1], [], []>} : vector<32x64xf32>, vector<64x64xf32>, vector<32x64xf32> -> vector<32x64xf32>
    %36 = arith.addf %35, %17 : vector<32x64xf32>
    %cst_27 = arith.constant 0.000000e+00 : f32
    %37 = vector.broadcast %cst_27 : f32 to vector<32x64xf32>
    %38 = arith.maximumf %36, %37 : vector<32x64xf32>
    %cst_28 = arith.constant dense<0.000000e+00> : vector<32x64xf32>
    %39 = tpu.matmul %38, %8, %cst_28 {dimension_numbers = #tpu.dot_dimension_numbers<[1], [0], [0], [1], [0, 0, 1, 1], [], []>} : vector<32x64xf32>, vector<64x64xf32>, vector<32x64xf32> -> vector<32x64xf32>
    %40 = arith.addf %39, %20 : vector<32x64xf32>
    %cst_29 = arith.constant 0.000000e+00 : f32
    %41 = vector.broadcast %cst_29 : f32 to vector<32x64xf32>
    %42 = arith.maximumf %40, %41 : vector<32x64xf32>
    %43 = arith.index_cast %c0_i32 : i32 to index
    %c0_30 = arith.constant 0 : index
    %c0_31 = arith.constant 0 : index
    %44 = vector.load %arg6[%43, %c0_30, %c0_31] : memref<8x32x64xf32, #tpu.memory_space<vmem>>, vector<1x32x64xf32>
    %45 = vector.shape_cast %44 : vector<1x32x64xf32> to vector<32x64xf32>
    %46 = vector.shape_cast %42 : vector<32x64xf32> to vector<1x32x64xf32>
    tpu.vector_store %arg6[%43, %c0_30, %c0_31], %46 {strides = array<i32>} : memref<8x32x64xf32, #tpu.memory_space<vmem>>, vector<1x32x64xf32>,
    %c1_i32 = arith.constant 1 : i32
    %47 = arith.index_cast %c1_i32 : i32 to index
    %c0_32 = arith.constant 0 : index
    %c0_33 = arith.constant 0 : index
    %48 = vector.load %arg1[%47, %c0_32, %c0_33] : memref<8x32x16xf32, #tpu.memory_space<vmem>>, vector<1x32x16xf32>
    %49 = vector.shape_cast %48 : vector<1x32x16xf32> to vector<32x16xf32>
    %cst_34 = arith.constant dense<0.000000e+00> : vector<32x64xf32>
    %50 = tpu.matmul %49, %0, %cst_34 {dimension_numbers = #tpu.dot_dimension_numbers<[1], [0], [0], [1], [0, 0, 1, 1], [], []>} : vector<32x16xf32>, vector<16x64xf32>, vector<32x64xf32> -> vector<32x64xf32>
    %cst_35 = arith.constant dense<0.000000e+00> : vector<32x64xf32>
    %51 = tpu.matmul %42, %2, %cst_35 {dimension_numbers = #tpu.dot_dimension_numbers<[1], [0], [0], [1], [0, 0, 1, 1], [], []>} : vector<32x64xf32>, vector<64x64xf32>, vector<32x64xf32> -> vector<32x64xf32>
    %52 = arith.addf %50, %51 : vector<32x64xf32>
    %53 = arith.addf %52, %11 : vector<32x64xf32>
    %cst_36 = arith.constant 0.000000e+00 : f32
    %54 = vector.broadcast %cst_36 : f32 to vector<32x64xf32>
    %55 = arith.maximumf %53, %54 : vector<32x64xf32>
    %cst_37 = arith.constant dense<0.000000e+00> : vector<32x64xf32>
    %56 = tpu.matmul %55, %4, %cst_37 {dimension_numbers = #tpu.dot_dimension_numbers<[1], [0], [0], [1], [0, 0, 1, 1], [], []>} : vector<32x64xf32>, vector<64x64xf32>, vector<32x64xf32> -> vector<32x64xf32>
    %57 = arith.addf %56, %14 : vector<32x64xf32>
    %cst_38 = arith.constant 0.000000e+00 : f32
    %58 = vector.broadcast %cst_38 : f32 to vector<32x64xf32>
    %59 = arith.maximumf %57, %58 : vector<32x64xf32>
    %cst_39 = arith.constant dense<0.000000e+00> : vector<32x64xf32>
    %60 = tpu.matmul %59, %6, %cst_39 {dimension_numbers = #tpu.dot_dimension_numbers<[1], [0], [0], [1], [0, 0, 1, 1], [], []>} : vector<32x64xf32>, vector<64x64xf32>, vector<32x64xf32> -> vector<32x64xf32>
    %61 = arith.addf %60, %17 : vector<32x64xf32>
    %cst_40 = arith.constant 0.000000e+00 : f32
    %62 = vector.broadcast %cst_40 : f32 to vector<32x64xf32>
    %63 = arith.maximumf %61, %62 : vector<32x64xf32>
    %cst_41 = arith.constant dense<0.000000e+00> : vector<32x64xf32>
    %64 = tpu.matmul %63, %8, %cst_41 {dimension_numbers = #tpu.dot_dimension_numbers<[1], [0], [0], [1], [0, 0, 1, 1], [], []>} : vector<32x64xf32>, vector<64x64xf32>, vector<32x64xf32> -> vector<32x64xf32>
    %65 = arith.addf %64, %20 : vector<32x64xf32>
    %cst_42 = arith.constant 0.000000e+00 : f32
    %66 = vector.broadcast %cst_42 : f32 to vector<32x64xf32>
    %67 = arith.maximumf %65, %66 : vector<32x64xf32>
    %68 = arith.index_cast %c1_i32 : i32 to index
    %c0_43 = arith.constant 0 : index
    %c0_44 = arith.constant 0 : index
    %69 = vector.load %arg6[%68, %c0_43, %c0_44] : memref<8x32x64xf32, #tpu.memory_space<vmem>>, vector<1x32x64xf32>
    %70 = vector.shape_cast %69 : vector<1x32x64xf32> to vector<32x64xf32>
    %71 = vector.shape_cast %67 : vector<32x64xf32> to vector<1x32x64xf32>
    tpu.vector_store %arg6[%68, %c0_43, %c0_44], %71 {strides = array<i32>} : memref<8x32x64xf32, #tpu.memory_space<vmem>>, vector<1x32x64xf32>,
    %c2_i32 = arith.constant 2 : i32
    %72 = arith.index_cast %c2_i32 : i32 to index
    %c0_45 = arith.constant 0 : index
    %c0_46 = arith.constant 0 : index
    %73 = vector.load %arg1[%72, %c0_45, %c0_46] : memref<8x32x16xf32, #tpu.memory_space<vmem>>, vector<1x32x16xf32>
    %74 = vector.shape_cast %73 : vector<1x32x16xf32> to vector<32x16xf32>
    %cst_47 = arith.constant dense<0.000000e+00> : vector<32x64xf32>
    %75 = tpu.matmul %74, %0, %cst_47 {dimension_numbers = #tpu.dot_dimension_numbers<[1], [0], [0], [1], [0, 0, 1, 1], [], []>} : vector<32x16xf32>, vector<16x64xf32>, vector<32x64xf32> -> vector<32x64xf32>
    %cst_48 = arith.constant dense<0.000000e+00> : vector<32x64xf32>
    %76 = tpu.matmul %67, %2, %cst_48 {dimension_numbers = #tpu.dot_dimension_numbers<[1], [0], [0], [1], [0, 0, 1, 1], [], []>} : vector<32x64xf32>, vector<64x64xf32>, vector<32x64xf32> -> vector<32x64xf32>
    %77 = arith.addf %75, %76 : vector<32x64xf32>
    %78 = arith.addf %77, %11 : vector<32x64xf32>
    %cst_49 = arith.constant 0.000000e+00 : f32
    %79 = vector.broadcast %cst_49 : f32 to vector<32x64xf32>
    %80 = arith.maximumf %78, %79 : vector<32x64xf32>
    %cst_50 = arith.constant dense<0.000000e+00> : vector<32x64xf32>
    %81 = tpu.matmul %80, %4, %cst_50 {dimension_numbers = #tpu.dot_dimension_numbers<[1], [0], [0], [1], [0, 0, 1, 1], [], []>} : vector<32x64xf32>, vector<64x64xf32>, vector<32x64xf32> -> vector<32x64xf32>
    %82 = arith.addf %81, %14 : vector<32x64xf32>
    %cst_51 = arith.constant 0.000000e+00 : f32
    %83 = vector.broadcast %cst_51 : f32 to vector<32x64xf32>
    %84 = arith.maximumf %82, %83 : vector<32x64xf32>
    %cst_52 = arith.constant dense<0.000000e+00> : vector<32x64xf32>
    %85 = tpu.matmul %84, %6, %cst_52 {dimension_numbers = #tpu.dot_dimension_numbers<[1], [0], [0], [1], [0, 0, 1, 1], [], []>} : vector<32x64xf32>, vector<64x64xf32>, vector<32x64xf32> -> vector<32x64xf32>
    %86 = arith.addf %85, %17 : vector<32x64xf32>
    %cst_53 = arith.constant 0.000000e+00 : f32
    %87 = vector.broadcast %cst_53 : f32 to vector<32x64xf32>
    %88 = arith.maximumf %86, %87 : vector<32x64xf32>
    %cst_54 = arith.constant dense<0.000000e+00> : vector<32x64xf32>
    %89 = tpu.matmul %88, %8, %cst_54 {dimension_numbers = #tpu.dot_dimension_numbers<[1], [0], [0], [1], [0, 0, 1, 1], [], []>} : vector<32x64xf32>, vector<64x64xf32>, vector<32x64xf32> -> vector<32x64xf32>
    %90 = arith.addf %89, %20 : vector<32x64xf32>
    %cst_55 = arith.constant 0.000000e+00 : f32
    %91 = vector.broadcast %cst_55 : f32 to vector<32x64xf32>
    %92 = arith.maximumf %90, %91 : vector<32x64xf32>
    %93 = arith.index_cast %c2_i32 : i32 to index
    %c0_56 = arith.constant 0 : index
    %c0_57 = arith.constant 0 : index
    %94 = vector.load %arg6[%93, %c0_56, %c0_57] : memref<8x32x64xf32, #tpu.memory_space<vmem>>, vector<1x32x64xf32>
    %95 = vector.shape_cast %94 : vector<1x32x64xf32> to vector<32x64xf32>
    %96 = vector.shape_cast %92 : vector<32x64xf32> to vector<1x32x64xf32>
    tpu.vector_store %arg6[%93, %c0_56, %c0_57], %96 {strides = array<i32>} : memref<8x32x64xf32, #tpu.memory_space<vmem>>, vector<1x32x64xf32>,
    %c3_i32 = arith.constant 3 : i32
    %97 = arith.index_cast %c3_i32 : i32 to index
    %c0_58 = arith.constant 0 : index
    %c0_59 = arith.constant 0 : index
    %98 = vector.load %arg1[%97, %c0_58, %c0_59] : memref<8x32x16xf32, #tpu.memory_space<vmem>>, vector<1x32x16xf32>
    %99 = vector.shape_cast %98 : vector<1x32x16xf32> to vector<32x16xf32>
    %cst_60 = arith.constant dense<0.000000e+00> : vector<32x64xf32>
    %100 = tpu.matmul %99, %0, %cst_60 {dimension_numbers = #tpu.dot_dimension_numbers<[1], [0], [0], [1], [0, 0, 1, 1], [], []>} : vector<32x16xf32>, vector<16x64xf32>, vector<32x64xf32> -> vector<32x64xf32>
    %cst_61 = arith.constant dense<0.000000e+00> : vector<32x64xf32>
    %101 = tpu.matmul %92, %2, %cst_61 {dimension_numbers = #tpu.dot_dimension_numbers<[1], [0], [0], [1], [0, 0, 1, 1], [], []>} : vector<32x64xf32>, vector<64x64xf32>, vector<32x64xf32> -> vector<32x64xf32>
    %102 = arith.addf %100, %101 : vector<32x64xf32>
    %103 = arith.addf %102, %11 : vector<32x64xf32>
    %cst_62 = arith.constant 0.000000e+00 : f32
    %104 = vector.broadcast %cst_62 : f32 to vector<32x64xf32>
    %105 = arith.maximumf %103, %104 : vector<32x64xf32>
    %cst_63 = arith.constant dense<0.000000e+00> : vector<32x64xf32>
    %106 = tpu.matmul %105, %4, %cst_63 {dimension_numbers = #tpu.dot_dimension_numbers<[1], [0], [0], [1], [0, 0, 1, 1], [], []>} : vector<32x64xf32>, vector<64x64xf32>, vector<32x64xf32> -> vector<32x64xf32>
    %107 = arith.addf %106, %14 : vector<32x64xf32>
    %cst_64 = arith.constant 0.000000e+00 : f32
    %108 = vector.broadcast %cst_64 : f32 to vector<32x64xf32>
    %109 = arith.maximumf %107, %108 : vector<32x64xf32>
    %cst_65 = arith.constant dense<0.000000e+00> : vector<32x64xf32>
    %110 = tpu.matmul %109, %6, %cst_65 {dimension_numbers = #tpu.dot_dimension_numbers<[1], [0], [0], [1], [0, 0, 1, 1], [], []>} : vector<32x64xf32>, vector<64x64xf32>, vector<32x64xf32> -> vector<32x64xf32>
    %111 = arith.addf %110, %17 : vector<32x64xf32>
    %cst_66 = arith.constant 0.000000e+00 : f32
    %112 = vector.broadcast %cst_66 : f32 to vector<32x64xf32>
    %113 = arith.maximumf %111, %112 : vector<32x64xf32>
    %cst_67 = arith.constant dense<0.000000e+00> : vector<32x64xf32>
    %114 = tpu.matmul %113, %8, %cst_67 {dimension_numbers = #tpu.dot_dimension_numbers<[1], [0], [0], [1], [0, 0, 1, 1], [], []>} : vector<32x64xf32>, vector<64x64xf32>, vector<32x64xf32> -> vector<32x64xf32>
    %115 = arith.addf %114, %20 : vector<32x64xf32>
    %cst_68 = arith.constant 0.000000e+00 : f32
    %116 = vector.broadcast %cst_68 : f32 to vector<32x64xf32>
    %117 = arith.maximumf %115, %116 : vector<32x64xf32>
    %118 = arith.index_cast %c3_i32 : i32 to index
    %c0_69 = arith.constant 0 : index
    %c0_70 = arith.constant 0 : index
    %119 = vector.load %arg6[%118, %c0_69, %c0_70] : memref<8x32x64xf32, #tpu.memory_space<vmem>>, vector<1x32x64xf32>
    %120 = vector.shape_cast %119 : vector<1x32x64xf32> to vector<32x64xf32>
    %121 = vector.shape_cast %117 : vector<32x64xf32> to vector<1x32x64xf32>
    tpu.vector_store %arg6[%118, %c0_69, %c0_70], %121 {strides = array<i32>} : memref<8x32x64xf32, #tpu.memory_space<vmem>>, vector<1x32x64xf32>,
    %c4_i32 = arith.constant 4 : i32
    %122 = arith.index_cast %c4_i32 : i32 to index
    %c0_71 = arith.constant 0 : index
    %c0_72 = arith.constant 0 : index
    %123 = vector.load %arg1[%122, %c0_71, %c0_72] : memref<8x32x16xf32, #tpu.memory_space<vmem>>, vector<1x32x16xf32>
    %124 = vector.shape_cast %123 : vector<1x32x16xf32> to vector<32x16xf32>
    %cst_73 = arith.constant dense<0.000000e+00> : vector<32x64xf32>
    %125 = tpu.matmul %124, %0, %cst_73 {dimension_numbers = #tpu.dot_dimension_numbers<[1], [0], [0], [1], [0, 0, 1, 1], [], []>} : vector<32x16xf32>, vector<16x64xf32>, vector<32x64xf32> -> vector<32x64xf32>
    %cst_74 = arith.constant dense<0.000000e+00> : vector<32x64xf32>
    %126 = tpu.matmul %117, %2, %cst_74 {dimension_numbers = #tpu.dot_dimension_numbers<[1], [0], [0], [1], [0, 0, 1, 1], [], []>} : vector<32x64xf32>, vector<64x64xf32>, vector<32x64xf32> -> vector<32x64xf32>
    %127 = arith.addf %125, %126 : vector<32x64xf32>
    %128 = arith.addf %127, %11 : vector<32x64xf32>
    %cst_75 = arith.constant 0.000000e+00 : f32
    %129 = vector.broadcast %cst_75 : f32 to vector<32x64xf32>
    %130 = arith.maximumf %128, %129 : vector<32x64xf32>
    %cst_76 = arith.constant dense<0.000000e+00> : vector<32x64xf32>
    %131 = tpu.matmul %130, %4, %cst_76 {dimension_numbers = #tpu.dot_dimension_numbers<[1], [0], [0], [1], [0, 0, 1, 1], [], []>} : vector<32x64xf32>, vector<64x64xf32>, vector<32x64xf32> -> vector<32x64xf32>
    %132 = arith.addf %131, %14 : vector<32x64xf32>
    %cst_77 = arith.constant 0.000000e+00 : f32
    %133 = vector.broadcast %cst_77 : f32 to vector<32x64xf32>
    %134 = arith.maximumf %132, %133 : vector<32x64xf32>
    %cst_78 = arith.constant dense<0.000000e+00> : vector<32x64xf32>
    %135 = tpu.matmul %134, %6, %cst_78 {dimension_numbers = #tpu.dot_dimension_numbers<[1], [0], [0], [1], [0, 0, 1, 1], [], []>} : vector<32x64xf32>, vector<64x64xf32>, vector<32x64xf32> -> vector<32x64xf32>
    %136 = arith.addf %135, %17 : vector<32x64xf32>
    %cst_79 = arith.constant 0.000000e+00 : f32
    %137 = vector.broadcast %cst_79 : f32 to vector<32x64xf32>
    %138 = arith.maximumf %136, %137 : vector<32x64xf32>
    %cst_80 = arith.constant dense<0.000000e+00> : vector<32x64xf32>
    %139 = tpu.matmul %138, %8, %cst_80 {dimension_numbers = #tpu.dot_dimension_numbers<[1], [0], [0], [1], [0, 0, 1, 1], [], []>} : vector<32x64xf32>, vector<64x64xf32>, vector<32x64xf32> -> vector<32x64xf32>
    %140 = arith.addf %139, %20 : vector<32x64xf32>
    %cst_81 = arith.constant 0.000000e+00 : f32
    %141 = vector.broadcast %cst_81 : f32 to vector<32x64xf32>
    %142 = arith.maximumf %140, %141 : vector<32x64xf32>
    %143 = arith.index_cast %c4_i32 : i32 to index
    %c0_82 = arith.constant 0 : index
    %c0_83 = arith.constant 0 : index
    %144 = vector.load %arg6[%143, %c0_82, %c0_83] : memref<8x32x64xf32, #tpu.memory_space<vmem>>, vector<1x32x64xf32>
    %145 = vector.shape_cast %144 : vector<1x32x64xf32> to vector<32x64xf32>
    %146 = vector.shape_cast %142 : vector<32x64xf32> to vector<1x32x64xf32>
    tpu.vector_store %arg6[%143, %c0_82, %c0_83], %146 {strides = array<i32>} : memref<8x32x64xf32, #tpu.memory_space<vmem>>, vector<1x32x64xf32>,
    %c5_i32 = arith.constant 5 : i32
    %147 = arith.index_cast %c5_i32 : i32 to index
    %c0_84 = arith.constant 0 : index
    %c0_85 = arith.constant 0 : index
    %148 = vector.load %arg1[%147, %c0_84, %c0_85] : memref<8x32x16xf32, #tpu.memory_space<vmem>>, vector<1x32x16xf32>
    %149 = vector.shape_cast %148 : vector<1x32x16xf32> to vector<32x16xf32>
    %cst_86 = arith.constant dense<0.000000e+00> : vector<32x64xf32>
    %150 = tpu.matmul %149, %0, %cst_86 {dimension_numbers = #tpu.dot_dimension_numbers<[1], [0], [0], [1], [0, 0, 1, 1], [], []>} : vector<32x16xf32>, vector<16x64xf32>, vector<32x64xf32> -> vector<32x64xf32>
    %cst_87 = arith.constant dense<0.000000e+00> : vector<32x64xf32>
    %151 = tpu.matmul %142, %2, %cst_87 {dimension_numbers = #tpu.dot_dimension_numbers<[1], [0], [0], [1], [0, 0, 1, 1], [], []>} : vector<32x64xf32>, vector<64x64xf32>, vector<32x64xf32> -> vector<32x64xf32>
    %152 = arith.addf %150, %151 : vector<32x64xf32>
    %153 = arith.addf %152, %11 : vector<32x64xf32>
    %cst_88 = arith.constant 0.000000e+00 : f32
    %154 = vector.broadcast %cst_88 : f32 to vector<32x64xf32>
    %155 = arith.maximumf %153, %154 : vector<32x64xf32>
    %cst_89 = arith.constant dense<0.000000e+00> : vector<32x64xf32>
    %156 = tpu.matmul %155, %4, %cst_89 {dimension_numbers = #tpu.dot_dimension_numbers<[1], [0], [0], [1], [0, 0, 1, 1], [], []>} : vector<32x64xf32>, vector<64x64xf32>, vector<32x64xf32> -> vector<32x64xf32>
    %157 = arith.addf %156, %14 : vector<32x64xf32>
    %cst_90 = arith.constant 0.000000e+00 : f32
    %158 = vector.broadcast %cst_90 : f32 to vector<32x64xf32>
    %159 = arith.maximumf %157, %158 : vector<32x64xf32>
    %cst_91 = arith.constant dense<0.000000e+00> : vector<32x64xf32>
    %160 = tpu.matmul %159, %6, %cst_91 {dimension_numbers = #tpu.dot_dimension_numbers<[1], [0], [0], [1], [0, 0, 1, 1], [], []>} : vector<32x64xf32>, vector<64x64xf32>, vector<32x64xf32> -> vector<32x64xf32>
    %161 = arith.addf %160, %17 : vector<32x64xf32>
    %cst_92 = arith.constant 0.000000e+00 : f32
    %162 = vector.broadcast %cst_92 : f32 to vector<32x64xf32>
    %163 = arith.maximumf %161, %162 : vector<32x64xf32>
    %cst_93 = arith.constant dense<0.000000e+00> : vector<32x64xf32>
    %164 = tpu.matmul %163, %8, %cst_93 {dimension_numbers = #tpu.dot_dimension_numbers<[1], [0], [0], [1], [0, 0, 1, 1], [], []>} : vector<32x64xf32>, vector<64x64xf32>, vector<32x64xf32> -> vector<32x64xf32>
    %165 = arith.addf %164, %20 : vector<32x64xf32>
    %cst_94 = arith.constant 0.000000e+00 : f32
    %166 = vector.broadcast %cst_94 : f32 to vector<32x64xf32>
    %167 = arith.maximumf %165, %166 : vector<32x64xf32>
    %168 = arith.index_cast %c5_i32 : i32 to index
    %c0_95 = arith.constant 0 : index
    %c0_96 = arith.constant 0 : index
    %169 = vector.load %arg6[%168, %c0_95, %c0_96] : memref<8x32x64xf32, #tpu.memory_space<vmem>>, vector<1x32x64xf32>
    %170 = vector.shape_cast %169 : vector<1x32x64xf32> to vector<32x64xf32>
    %171 = vector.shape_cast %167 : vector<32x64xf32> to vector<1x32x64xf32>
    tpu.vector_store %arg6[%168, %c0_95, %c0_96], %171 {strides = array<i32>} : memref<8x32x64xf32, #tpu.memory_space<vmem>>, vector<1x32x64xf32>,
    %c6_i32 = arith.constant 6 : i32
    %172 = arith.index_cast %c6_i32 : i32 to index
    %c0_97 = arith.constant 0 : index
    %c0_98 = arith.constant 0 : index
    %173 = vector.load %arg1[%172, %c0_97, %c0_98] : memref<8x32x16xf32, #tpu.memory_space<vmem>>, vector<1x32x16xf32>
    %174 = vector.shape_cast %173 : vector<1x32x16xf32> to vector<32x16xf32>
    %cst_99 = arith.constant dense<0.000000e+00> : vector<32x64xf32>
    %175 = tpu.matmul %174, %0, %cst_99 {dimension_numbers = #tpu.dot_dimension_numbers<[1], [0], [0], [1], [0, 0, 1, 1], [], []>} : vector<32x16xf32>, vector<16x64xf32>, vector<32x64xf32> -> vector<32x64xf32>
    %cst_100 = arith.constant dense<0.000000e+00> : vector<32x64xf32>
    %176 = tpu.matmul %167, %2, %cst_100 {dimension_numbers = #tpu.dot_dimension_numbers<[1], [0], [0], [1], [0, 0, 1, 1], [], []>} : vector<32x64xf32>, vector<64x64xf32>, vector<32x64xf32> -> vector<32x64xf32>
    %177 = arith.addf %175, %176 : vector<32x64xf32>
    %178 = arith.addf %177, %11 : vector<32x64xf32>
    %cst_101 = arith.constant 0.000000e+00 : f32
    %179 = vector.broadcast %cst_101 : f32 to vector<32x64xf32>
    %180 = arith.maximumf %178, %179 : vector<32x64xf32>
    %cst_102 = arith.constant dense<0.000000e+00> : vector<32x64xf32>
    %181 = tpu.matmul %180, %4, %cst_102 {dimension_numbers = #tpu.dot_dimension_numbers<[1], [0], [0], [1], [0, 0, 1, 1], [], []>} : vector<32x64xf32>, vector<64x64xf32>, vector<32x64xf32> -> vector<32x64xf32>
    %182 = arith.addf %181, %14 : vector<32x64xf32>
    %cst_103 = arith.constant 0.000000e+00 : f32
    %183 = vector.broadcast %cst_103 : f32 to vector<32x64xf32>
    %184 = arith.maximumf %182, %183 : vector<32x64xf32>
    %cst_104 = arith.constant dense<0.000000e+00> : vector<32x64xf32>
    %185 = tpu.matmul %184, %6, %cst_104 {dimension_numbers = #tpu.dot_dimension_numbers<[1], [0], [0], [1], [0, 0, 1, 1], [], []>} : vector<32x64xf32>, vector<64x64xf32>, vector<32x64xf32> -> vector<32x64xf32>
    %186 = arith.addf %185, %17 : vector<32x64xf32>
    %cst_105 = arith.constant 0.000000e+00 : f32
    %187 = vector.broadcast %cst_105 : f32 to vector<32x64xf32>
    %188 = arith.maximumf %186, %187 : vector<32x64xf32>
    %cst_106 = arith.constant dense<0.000000e+00> : vector<32x64xf32>
    %189 = tpu.matmul %188, %8, %cst_106 {dimension_numbers = #tpu.dot_dimension_numbers<[1], [0], [0], [1], [0, 0, 1, 1], [], []>} : vector<32x64xf32>, vector<64x64xf32>, vector<32x64xf32> -> vector<32x64xf32>
    %190 = arith.addf %189, %20 : vector<32x64xf32>
    %cst_107 = arith.constant 0.000000e+00 : f32
    %191 = vector.broadcast %cst_107 : f32 to vector<32x64xf32>
    %192 = arith.maximumf %190, %191 : vector<32x64xf32>
    %193 = arith.index_cast %c6_i32 : i32 to index
    %c0_108 = arith.constant 0 : index
    %c0_109 = arith.constant 0 : index
    %194 = vector.load %arg6[%193, %c0_108, %c0_109] : memref<8x32x64xf32, #tpu.memory_space<vmem>>, vector<1x32x64xf32>
    %195 = vector.shape_cast %194 : vector<1x32x64xf32> to vector<32x64xf32>
    %196 = vector.shape_cast %192 : vector<32x64xf32> to vector<1x32x64xf32>
    tpu.vector_store %arg6[%193, %c0_108, %c0_109], %196 {strides = array<i32>} : memref<8x32x64xf32, #tpu.memory_space<vmem>>, vector<1x32x64xf32>,
    %c7_i32 = arith.constant 7 : i32
    %197 = arith.index_cast %c7_i32 : i32 to index
    %c0_110 = arith.constant 0 : index
    %c0_111 = arith.constant 0 : index
    %198 = vector.load %arg1[%197, %c0_110, %c0_111] : memref<8x32x16xf32, #tpu.memory_space<vmem>>, vector<1x32x16xf32>
    %199 = vector.shape_cast %198 : vector<1x32x16xf32> to vector<32x16xf32>
    %cst_112 = arith.constant dense<0.000000e+00> : vector<32x64xf32>
    %200 = tpu.matmul %199, %0, %cst_112 {dimension_numbers = #tpu.dot_dimension_numbers<[1], [0], [0], [1], [0, 0, 1, 1], [], []>} : vector<32x16xf32>, vector<16x64xf32>, vector<32x64xf32> -> vector<32x64xf32>
    %cst_113 = arith.constant dense<0.000000e+00> : vector<32x64xf32>
    %201 = tpu.matmul %192, %2, %cst_113 {dimension_numbers = #tpu.dot_dimension_numbers<[1], [0], [0], [1], [0, 0, 1, 1], [], []>} : vector<32x64xf32>, vector<64x64xf32>, vector<32x64xf32> -> vector<32x64xf32>
    %202 = arith.addf %200, %201 : vector<32x64xf32>
    %203 = arith.addf %202, %11 : vector<32x64xf32>
    %cst_114 = arith.constant 0.000000e+00 : f32
    %204 = vector.broadcast %cst_114 : f32 to vector<32x64xf32>
    %205 = arith.maximumf %203, %204 : vector<32x64xf32>
    %cst_115 = arith.constant dense<0.000000e+00> : vector<32x64xf32>
    %206 = tpu.matmul %205, %4, %cst_115 {dimension_numbers = #tpu.dot_dimension_numbers<[1], [0], [0], [1], [0, 0, 1, 1], [], []>} : vector<32x64xf32>, vector<64x64xf32>, vector<32x64xf32> -> vector<32x64xf32>
    %207 = arith.addf %206, %14 : vector<32x64xf32>
    %cst_116 = arith.constant 0.000000e+00 : f32
    %208 = vector.broadcast %cst_116 : f32 to vector<32x64xf32>
    %209 = arith.maximumf %207, %208 : vector<32x64xf32>
    %cst_117 = arith.constant dense<0.000000e+00> : vector<32x64xf32>
    %210 = tpu.matmul %209, %6, %cst_117 {dimension_numbers = #tpu.dot_dimension_numbers<[1], [0], [0], [1], [0, 0, 1, 1], [], []>} : vector<32x64xf32>, vector<64x64xf32>, vector<32x64xf32> -> vector<32x64xf32>
    %211 = arith.addf %210, %17 : vector<32x64xf32>
    %cst_118 = arith.constant 0.000000e+00 : f32
    %212 = vector.broadcast %cst_118 : f32 to vector<32x64xf32>
    %213 = arith.maximumf %211, %212 : vector<32x64xf32>
    %cst_119 = arith.constant dense<0.000000e+00> : vector<32x64xf32>
    %214 = tpu.matmul %213, %8, %cst_119 {dimension_numbers = #tpu.dot_dimension_numbers<[1], [0], [0], [1], [0, 0, 1, 1], [], []>} : vector<32x64xf32>, vector<64x64xf32>, vector<32x64xf32> -> vector<32x64xf32>
    %215 = arith.addf %214, %20 : vector<32x64xf32>
    %cst_120 = arith.constant 0.000000e+00 : f32
    %216 = vector.broadcast %cst_120 : f32 to vector<32x64xf32>
    %217 = arith.maximumf %215, %216 : vector<32x64xf32>
    %218 = arith.index_cast %c7_i32 : i32 to index
    %c0_121 = arith.constant 0 : index
    %c0_122 = arith.constant 0 : index
    %219 = vector.load %arg6[%218, %c0_121, %c0_122] : memref<8x32x64xf32, #tpu.memory_space<vmem>>, vector<1x32x64xf32>
    %220 = vector.shape_cast %219 : vector<1x32x64xf32> to vector<32x64xf32>
    %221 = vector.shape_cast %217 : vector<32x64xf32> to vector<1x32x64xf32>
    tpu.vector_store %arg6[%218, %c0_121, %c0_122], %221 {strides = array<i32>} : memref<8x32x64xf32, #tpu.memory_space<vmem>>, vector<1x32x64xf32>,
    %c8_i32 = arith.constant 8 : i32
    %c0_123 = arith.constant 0 : index
    %c0_124 = arith.constant 0 : index
    %222 = vector.load %arg7[%c0_123, %c0_124] : memref<32x64xf32, #tpu.memory_space<vmem>>, vector<32x64xf32>
    tpu.vector_store %arg7[%c0_123, %c0_124], %217 {strides = array<i32>} : memref<32x64xf32, #tpu.memory_space<vmem>>, vector<32x64xf32>,
    return
  }
  func.func @transform_0(%arg0: i32) -> (i32, i32, i32) {
    %c0_i32 = arith.constant 0 : i32
    %c0_i32_0 = arith.constant 0 : i32
    %c0_i32_1 = arith.constant 0 : i32
    %c0_i32_2 = arith.constant 0 : i32
    return %c0_i32, %c0_i32_0, %c0_i32_1 : i32, i32, i32
  }
  func.func @transform_1(%arg0: i32) -> (i32, i32) {
    %c0_i32 = arith.constant 0 : i32
    %c0_i32_0 = arith.constant 0 : i32
    %c0_i32_1 = arith.constant 0 : i32
    return %c0_i32, %c0_i32_0 : i32, i32
  }
  func.func @transform_2(%arg0: i32) -> (i32, i32) {
    %c0_i32 = arith.constant 0 : i32
    %c0_i32_0 = arith.constant 0 : i32
    %c0_i32_1 = arith.constant 0 : i32
    return %c0_i32, %c0_i32_0 : i32, i32
  }
  func.func @transform_3(%arg0: i32) -> (i32, i32, i32) {
    %c0_i32 = arith.constant 0 : i32
    %c0_i32_0 = arith.constant 0 : i32
    %c0_i32_1 = arith.constant 0 : i32
    %c0_i32_2 = arith.constant 0 : i32
    return %c0_i32, %c0_i32_0, %c0_i32_1 : i32, i32, i32
  }
  func.func @transform_4(%arg0: i32) -> (i32, i32) {
    %c0_i32 = arith.constant 0 : i32
    %c0_i32_0 = arith.constant 0 : i32
    %c0_i32_1 = arith.constant 0 : i32
    return %c0_i32, %c0_i32_0 : i32, i32
  }
  func.func @transform_5(%arg0: i32) -> (i32, i32, i32) {
    %c0_i32 = arith.constant 0 : i32
    %c0_i32_0 = arith.constant 0 : i32
    %c0_i32_1 = arith.constant 0 : i32
    %c0_i32_2 = arith.constant 0 : i32
    return %c0_i32, %c0_i32_0, %c0_i32_1 : i32, i32, i32
  }
  func.func @transform_6(%arg0: i32) -> (i32, i32) {
    %c0_i32 = arith.constant 0 : i32
    %c0_i32_0 = arith.constant 0 : i32
    %c0_i32_1 = arith.constant 0 : i32
    return %c0_i32, %c0_i32_0 : i32, i32
  }
}

</mosaic_0001>

<bundles_post_ra>
// kernel: circular_world_rollout_tm.1
= control target key start
LH: loop header
LB: loop body
LE: loop exit
PB: predicated region body
PF: predicated region fallthrough
CT: control target
= control target key end

     0   :  { %12 = vsyncpa [#allocation3], 0  ;;  %vm89_vm0 = vcmask 523264   ;;  %s7166_s0 = inlined_call_operand.vmem [shape: f32[8,32,16], index: 0, kind: input, shape index: {}]   ;;  %s7167_s1 = inlined_call_operand.vmem [shape: f32[32,64], index: 1, kind: input, shape index: {}]   ;;  %s7168_s2 = inlined_call_operand.vmem [shape: f32[16,64], index: 2, kind: input, shape index: {}]   ;;  %s7169_s3 = inlined_call_operand.vmem [shape: f32[4,64,64], index: 3, kind: input, shape index: {}]   ;;  %s7170_s4 = inlined_call_operand.vmem [shape: f32[4,64], index: 4, kind: input, shape index: {}]   ;;  %s7171_s5 = inlined_call_operand.hbm [shape: f32[8,32,64], index: 5, kind: output, shape index: {0}]   ;;  %s7172_s6 = inlined_call_operand.hbm [shape: f32[32,64], index: 6, kind: output, shape index: {1}]  }
   0x1   :  { %v5803_v0 = vld [vmem:[%s7169_s3 + $0x38] sm:$0xff]  ;;  %v5808_v1 = vld [vmem:[%s7169_s3 + $0x30] sm:$0xff]  ;;  %v5815_v2 = vld [vmem:[%s7169_s3 + $0x28] sm:$0xff] }
   0x2   :  { %4889 = vmatprep.subr.mxu0 %v5803_v0  ;;  %v81_v3 = vld [vmem:[%s7167_s1] sm:$0xff]  ;;  %v5833_v5 = vld [vmem:[%s7169_s3 + $0x18] sm:$0xff] }
   0x3   :  { %4890 = vmatpush3.msra.mxu0 %v5803_v0  ;;  %4905 = vmatprep.mubr.msk.f32.mxu0 %vm89_vm0, %v81_v3  ;;  %v5826_v4 = vld [vmem:[%s7169_s3 + $0x20] sm:$0xff] }
   0x4   :  { %4891 = vmatprep.subr.mxu0 %v5808_v1 }
   0x5   :  { %4892 = vmatpush3.msra.mxu0 %v5808_v1 }
   0x6   :  { %4893 = vmatprep.subr.mxu0 %v5815_v2 }
   0x7   :  { %4894 = vmatpush3.msra.mxu0 %v5815_v2 }
   0x8   :  { %13 = vsyncpa [#allocation5], 0  ;;  %4895 = vmatprep.subr.mxu0 %v5826_v4  ;;  %v5840_v6 = vld [vmem:[%s7169_s3 + $0x10] sm:$0xff]  ;;  %v5847_v7 = vld [vmem:[%s7169_s3 + $0x8] sm:$0xff]  ;;  %vm187_vm1 = vcmask 130048   ;;  %s5762_s20 = smov [#allocation4]  }
   0x9   :  { %4896 = vmatpush3.msra.mxu0 %v5826_v4  ;;  %v5854_v8 = vld [vmem:[%s7169_s3] sm:$0xff]  ;;  %v82_v9 = vld [vmem:[%s7167_s1 + $0x8] sm:$0xff]  ;;  %v83_v11 = vld [vmem:[%s7167_s1 + $0x10] sm:$0xff]  ;;  %s4226_s21 = sshll.u32 %s5762_s20, 4  ;;  %s4227_s21 = int_to_ptr.vmem [resolvable:$true] %s4226_s21 }
   0xa   :  { %4897 = vmatprep.subr.mxu0 %v5833_v5  ;;  %v5864_v10 = vld [vmem:[%s7168_s2 + $0x8] sm:$0xff]  ;;  %v5874_v12 = vld [vmem:[%s7168_s2] sm:$0xff]  ;;  %v84_v13 = vld [vmem:[%s7167_s1 + $0x18] sm:$0xff] }
   0xb   :  { %4898 = vmatpush3.msra.mxu0 %v5833_v5  ;;  %v85_v14 = vld [vmem:[%s7166_s0] sm:$0xff]  ;;  %v86_v15 = vld [vmem:[%s7166_s0 + $0x8] sm:$0xff]  ;;  %v87_v16 = vld [vmem:[%s7166_s0 + $0x10] sm:$0xff] }
   0xc   :  { %4899 = vmatprep.subr.mxu0 %v5840_v6  ;;  %v88_v17 = vld [vmem:[%s7166_s0 + $0x18] sm:$0xff]  ;;  %v5912_v19 = vld [vmem:[%s7169_s3 + $0x70] sm:$0xff]  ;;  %v5919_v20 = vld [vmem:[%s7169_s3 + $0x68] sm:$0xff] }
   0xd   :  { %4900 = vmatpush3.msra.mxu0 %v5840_v6  ;;  %v5905_v18 = vld [vmem:[%s7169_s3 + $0x78] sm:$0xff]  ;;  %v5926_v21 = vld [vmem:[%s7169_s3 + $0x60] sm:$0xff]  ;;  %v5940_v23 = vld [vmem:[%s7169_s3 + $0x50] sm:$0xff] }
   0xe   :  { %4901 = vmatprep.subr.mxu0 %v5847_v7  ;;  %4921 = vmatprep.subr.mxu1 %v5905_v18  ;;  %v5933_v22 = vld [vmem:[%s7169_s3 + $0x58] sm:$0xff]  ;;  %v5947_v24 = vld [vmem:[%s7169_s3 + $0x48] sm:$0xff]  ;;  %v5954_v25 = vld [vmem:[%s7169_s3 + $0x40] sm:$0xff] }
   0xf   :  { %4902 = vmatpush3.msra.mxu0 %v5847_v7  ;;  %4922 = vmatpush3.msra.mxu1 %v5905_v18  ;;  %v5961_v26 = vld [vmem:[%s7169_s3 + $0xb8] sm:$0xff]  ;;  %v5966_v27 = vld [vmem:[%s7169_s3 + $0xb0] sm:$0xff]  ;;  %v5973_v28 = vld [vmem:[%s7169_s3 + $0xa8] sm:$0xff] }
  0x10   :  { %4903 = vmatprep.subr.mxu0 %v5854_v8  ;;  %4923 = vmatprep.subr.mxu1 %v5912_v19  ;;  %v5980_v29 = vld [vmem:[%s7169_s3 + $0xa0] sm:$0xff]  ;;  %v6002_v51 = vld [vmem:[%s7169_s3 + $0x98] sm:$0xff]  ;;  %v6009_v52 = vld [vmem:[%s7169_s3 + $0x90] sm:$0xff] }
  0x11   :  { %4904 = vmatpush3.msra.mxu0 %v5854_v8  ;;  %4924 = vmatpush3.msra.mxu1 %v5912_v19  ;;  %v5989_v35 = vld [vmem:[%s7170_s4] ss:$0 sm:$0xff]  ;;  %v6016_v53 = vld [vmem:[%s7169_s3 + $0x88] sm:$0xff]  ;;  %v6031_v55 = vld [vmem:[%s7169_s3 + $0xf8] sm:$0xff] }
  0x12   :  { %4906 = vmatmul.mubr.msk.f32.vlgmr.msra.gmra.mxu0 %vm89_vm0, %v82_v9  ;;  %4911 = vmatprep.subr.mxu0 %v5864_v10  ;;  %v6023_v54 = vld [vmem:[%s7169_s3 + $0x80] sm:$0xff]  ;;  %v6036_v56 = vld [vmem:[%s7169_s3 + $0xf0] sm:$0xff]  ;;  %v6043_v57 = vld [vmem:[%s7169_s3 + $0xe8] sm:$0xff] }
  0x13   :  { %4912 = vmatpush3.msra.mxu0 %v5864_v10  ;;  %4908 = vmatprep.mubr.msk.f32.mxu0 %vm89_vm0, %v83_v11  ;;  %v6050_v58 = vld [vmem:[%s7169_s3 + $0xe0] sm:$0xff] }
  0x14   :  { %4913 = vmatprep.subr.mxu0 %v5874_v12  ;;  %4925 = vmatprep.subr.mxu1 %v5919_v20  ;;  %v6059_v59 = vld [vmem:[%s7170_s4 + $0x1] ss:$0 sm:$0xff] }
  0x15   :  { %4914 = vmatpush3.msra.mxu0 %v5874_v12  ;;  %4926 = vmatpush3.msra.mxu1 %v5919_v20 }
  0x16   :  { %4909 = vmatmul.mubr.msk.f32.gmra.mxu0 %vm89_vm0, %v84_v13  ;;  %4927 = vmatprep.subr.mxu1 %v5926_v21 }
  0x17   :  { %4915 = vmatprep.mubr.msk.f32.mxu0 %vm187_vm1, %v85_v14  ;;  %4928 = vmatpush3.msra.mxu1 %v5926_v21 }
  0x18   :  { %4929 = vmatprep.subr.mxu1 %v5933_v22  ;;  %4943 = vmatprep.subr.mxu0 %v5961_v26 }
  0x19   :  { %4930 = vmatpush3.msra.mxu1 %v5933_v22 }
  0x1a   :  { %4916 = vmatmul.mubr.msk.f32.vlgmr.msra.gmra.mxu0 %vm187_vm1, %v86_v15  ;;  %4931 = vmatprep.subr.mxu1 %v5940_v23 }
  0x1b   :  { %4918 = vmatprep.mubr.msk.f32.mxu0 %vm187_vm1, %v87_v16  ;;  %4932 = vmatpush3.msra.mxu1 %v5940_v23 }
  0x1c   :  { %4933 = vmatprep.subr.mxu1 %v5947_v24  ;;  %4944 = vmatpush3.msra.mxu0 %v5961_v26 }
  0x1d   :  { %4934 = vmatpush3.msra.mxu1 %v5947_v24  ;;  %4945 = vmatprep.subr.mxu0 %v5966_v27 }
  0x1e   :  { %4919 = vmatmul.mubr.msk.f32.gmra.mxu0 %vm187_vm1, %v88_v17  ;;  %4935 = vmatprep.subr.mxu1 %v5954_v25 }
  0x1f   :  { %4936 = vmatpush3.msra.mxu1 %v5954_v25  ;;  %4946 = vmatpush3.msra.mxu0 %v5966_v27 }
  0x20   :  { %4947 = vmatprep.subr.mxu0 %v5973_v28  ;;  %4965 = vmatprep.subr.mxu1 %v6031_v55 }
  0x21   :  { %4948 = vmatpush3.msra.mxu0 %v5973_v28 }
  0x22   :  { %4949 = vmatprep.subr.mxu0 %v5980_v29 }
  0x23   :  { %4950 = vmatpush3.msra.mxu0 %v5980_v29 }
  0x24   :  { %4951 = vmatprep.subr.mxu0 %v6002_v51 }
  0x25   :  { %4952 = vmatpush3.msra.mxu0 %v6002_v51 }
  0x26   :  { %4953 = vmatprep.subr.mxu0 %v6009_v52 }
  0x27   :  { %4954 = vmatpush3.msra.mxu0 %v6009_v52 }
  0x28   :  { %4955 = vmatprep.subr.mxu0 %v6016_v53 }
  0x29   :  { %4956 = vmatpush3.msra.mxu0 %v6016_v53 }
  0x2a   :  { %4957 = vmatprep.subr.mxu0 %v6023_v54 }
  0x2b   :  { %4958 = vmatpush3.msra.mxu0 %v6023_v54 }
  0x2c   :  { %4987 = vmatprep.subr.mxu0 %v5803_v0 }
  0xd2   :  { %v4907_v30 = vpop.f32.mrf.mxu0 }
  0xd4   :  { %v168_v31 = vpop.f32.mrf.mxu0 }
  0xd6   :  { %v4910_v32 = vpop.f32.mrf.mxu0 }
  0xd8   :  { %v178_v33 = vpop.f32.mrf.mxu0 }
  0xda   :  { %v4917_v34 = vpop.f32.mrf.mxu0 }
  0xdb   :  { %v272_v36 = vadd.f32 %v4917_v34, %v4907_v30  ;;  %v6088_v30 = vld [vmem:[%s7169_s3 + $0xd8] sm:$0xff]  ;;  %v6117_v34 = vld [vmem:[%s7170_s4 + $0x2] ss:$0 sm:$0xff] }
  0xdc   :  { %v266_v37 = vpop.f32.mrf.mxu0 }
  0xdd   :  { %v267_v38 = vadd.f32 %v266_v37, %v168_v31  ;;  %v286_v39 = vadd.f32 %v5989_v35, %v272_v36  ;;  %v6095_v31 = vld [vmem:[%s7169_s3 + $0xd0] sm:$0xff] }
  0xde   :  { %v4920_v40 = vpop.f32.mrf.mxu0 }
  0xdf   :  { %v282_v41 = vadd.f32 %v4920_v40, %v4910_v32  ;;  %v285_v42 = vadd.f32 %v5989_v35, %v267_v38  ;;  %v290_v46 = vmax.f32 %v286_v39, 0.0  ;;  %v6102_v32 = vld [vmem:[%s7169_s3 + $0xc8] sm:$0xff] }
  0xe0   :  { %v276_v43 = vpop.f32.mrf.mxu0 }
  0xe1   :  { %v277_v44 = vadd.f32 %v276_v43, %v178_v33  ;;  %v289_v45 = vmax.f32 %v285_v42, 0.0  ;;  %v288_v47 = vadd.f32 %v5989_v35, %v282_v41  ;;  %v6109_v33 = vld [vmem:[%s7169_s3 + $0xc0] sm:$0xff] }
  0xe3   :  { %v287_v48 = vadd.f32 %v5989_v35, %v277_v44  ;;  %4937 = vmatprep.mubr.msk.f32.mxu1 %vm89_vm0, %v289_v45  ;;  %v292_v50 = vmax.f32 %v288_v47, 0.0 }
  0xe4   :  { %4938 = vmatmul.mubr.msk.f32.vlgmr.msra.gmra.mxu1 %vm89_vm0, %v290_v46 }
  0xe5   :  { %v291_v49 = vmax.f32 %v287_v48, 0.0  ;;  %4966 = vmatpush3.msra.mxu1 %v6031_v55  ;;  %v4289_v48 = vld [vmem:[%s7166_s0 + $0x20] sm:$0xff] }
  0xe6   :  { %4967 = vmatprep.subr.mxu1 %v6036_v56 }
  0xe7   :  { %4940 = vmatprep.mubr.msk.f32.mxu1 %vm89_vm0, %v291_v49  ;;  %4968 = vmatpush3.msra.mxu1 %v6036_v56  ;;  %v4290_v49 = vld [vmem:[%s7166_s0 + $0x28] sm:$0xff] }
  0xe8   :  { %4941 = vmatmul.mubr.msk.f32.gmra.mxu1 %vm89_vm0, %v292_v50  ;;  %4969 = vmatprep.subr.mxu1 %v6043_v57  ;;  %v4291_v50 = vld [vmem:[%s7166_s0 + $0x30] sm:$0xff] }
  0xe9   :  { %4970 = vmatpush3.msra.mxu1 %v6043_v57 }
  0xea   :  { %4971 = vmatprep.subr.mxu1 %v6050_v58 }
  0xeb   :  { %4972 = vmatpush3.msra.mxu1 %v6050_v58 }
  0xec   :  { %4973 = vmatprep.subr.mxu1 %v6088_v30 }
  0xed   :  { %4974 = vmatpush3.msra.mxu1 %v6088_v30 }
  0xee   :  { %4975 = vmatprep.subr.mxu1 %v6095_v31 }
  0xef   :  { %4976 = vmatpush3.msra.mxu1 %v6095_v31 }
  0xf0   :  { %4977 = vmatprep.subr.mxu1 %v6102_v32 }
  0xf1   :  { %4978 = vmatpush3.msra.mxu1 %v6102_v32 }
  0xf2   :  { %4979 = vmatprep.subr.mxu1 %v6109_v33 }
  0xf3   :  { %4980 = vmatpush3.msra.mxu1 %v6109_v33 }
  0xf4   :  { %5009 = vmatprep.subr.mxu1 %v5864_v10 }
 0x1a4   :  { %v4939_v60 = vpop.f32.mrf.mxu1 }
 0x1a5   :  { %v377_v61 = vadd.f32 %v4939_v60, %v6059_v59  ;;  %v4292_v60 = vld [vmem:[%s7166_s0 + $0x38] sm:$0xff] }
 0x1a6   :  { %v371_v62 = vpop.f32.mrf.mxu1 }
 0x1a7   :  { %v372_v63 = vadd.f32 %v6059_v59, %v371_v62  ;;  %v391_v11 = vmax.f32 %v377_v61, 0.0  ;;  %v6166_v61 = vld [vmem:[%s7170_s4 + $0x3] ss:$0 sm:$0xff] }
 0x1a8   :  { %v4942_v3 = vpop.f32.mrf.mxu1 }
 0x1a9   :  { %v390_v9 = vmax.f32 %v372_v63, 0.0  ;;  %v387_v13 = vadd.f32 %v4942_v3, %v6059_v59 }
 0x1aa   :  { %v381_v14 = vpop.f32.mrf.mxu1 }
 0x1ab   :  { %v382_v15 = vadd.f32 %v6059_v59, %v381_v14  ;;  %4959 = vmatprep.mubr.msk.f32.mxu0 %vm89_vm0, %v390_v9  ;;  %v393_v17 = vmax.f32 %v387_v13, 0.0 }
 0x1ac   :  { %4960 = vmatmul.mubr.msk.f32.vlgmr.msra.gmra.mxu0 %vm89_vm0, %v391_v11 }
 0x1ad   :  { %v392_v16 = vmax.f32 %v382_v15, 0.0  ;;  %4988 = vmatpush3.msra.mxu0 %v5803_v0 }
 0x1ae   :  { %4989 = vmatprep.subr.mxu0 %v5808_v1 }
 0x1af   :  { %4962 = vmatprep.mubr.msk.f32.mxu0 %vm89_vm0, %v392_v16  ;;  %4990 = vmatpush3.msra.mxu0 %v5808_v1 }
 0x1b0   :  { %4963 = vmatmul.mubr.msk.f32.gmra.mxu0 %vm89_vm0, %v393_v17  ;;  %4991 = vmatprep.subr.mxu0 %v5815_v2 }
 0x1b1   :  { %4992 = vmatpush3.msra.mxu0 %v5815_v2 }
 0x1b2   :  { %4993 = vmatprep.subr.mxu0 %v5826_v4 }
 0x1b3   :  { %4994 = vmatpush3.msra.mxu0 %v5826_v4 }
 0x1b4   :  { %4995 = vmatprep.subr.mxu0 %v5833_v5 }
 0x1b5   :  { %4996 = vmatpush3.msra.mxu0 %v5833_v5 }
 0x1b6   :  { %4997 = vmatprep.subr.mxu0 %v5840_v6 }
 0x1b7   :  { %4998 = vmatpush3.msra.mxu0 %v5840_v6 }
 0x1b8   :  { %4999 = vmatprep.subr.mxu0 %v5847_v7 }
 0x1b9   :  { %5000 = vmatpush3.msra.mxu0 %v5847_v7 }
 0x1ba   :  { %5001 = vmatprep.subr.mxu0 %v5854_v8 }
 0x1bb   :  { %5002 = vmatpush3.msra.mxu0 %v5854_v8 }
 0x1bc   :  { %5041 = vmatprep.subr.mxu0 %v5961_v26 }
 0x26c   :  { %v4961_v36 = vpop.f32.mrf.mxu0 }
 0x26d   :  { %v478_v37 = vadd.f32 %v4961_v36, %v6117_v34 }
 0x26e   :  { %v472_v38 = vpop.f32.mrf.mxu0 }
 0x26f   :  { %v473_v39 = vadd.f32 %v6117_v34, %v472_v38  ;;  %v492_v42 = vmax.f32 %v478_v37, 0.0 }
 0x270   :  { %v4964_v40 = vpop.f32.mrf.mxu0 }
 0x271   :  { %v491_v41 = vmax.f32 %v473_v39, 0.0  ;;  %v488_v43 = vadd.f32 %v4964_v40, %v6117_v34 }
 0x272   :  { %v482_v44 = vpop.f32.mrf.mxu0 }
 0x273   :  { %v483_v45 = vadd.f32 %v6117_v34, %v482_v44  ;;  %4981 = vmatprep.mubr.msk.f32.mxu1 %vm89_vm0, %v491_v41  ;;  %v494_v47 = vmax.f32 %v488_v43, 0.0 }
 0x274   :  { %4982 = vmatmul.mubr.msk.f32.vlgmr.msra.gmra.mxu1 %vm89_vm0, %v492_v42 }
 0x275   :  { %v493_v46 = vmax.f32 %v483_v45, 0.0  ;;  %5010 = vmatpush3.msra.mxu1 %v5864_v10 }
 0x276   :  { %5011 = vmatprep.subr.mxu1 %v5874_v12 }
 0x277   :  { %4984 = vmatprep.mubr.msk.f32.mxu1 %vm89_vm0, %v493_v46  ;;  %5012 = vmatpush3.msra.mxu1 %v5874_v12 }
 0x278   :  { %4985 = vmatmul.mubr.msk.f32.gmra.mxu1 %vm89_vm0, %v494_v47  ;;  %5019 = vmatprep.subr.mxu1 %v5905_v18 }
 0x279   :  { %5013 = vmatprep.mubr.msk.f32.mxu1 %vm187_vm1, %v4289_v48 }
 0x27c   :  { %5014 = vmatmul.mubr.msk.f32.vlgmr.msra.gmra.mxu1 %vm187_vm1, %v4290_v49 }
 0x27d   :  { %5020 = vmatpush3.msra.mxu1 %v5905_v18  ;;  %5016 = vmatprep.mubr.msk.f32.mxu1 %vm187_vm1, %v4291_v50 }
 0x27e   :  { %5021 = vmatprep.subr.mxu1 %v5912_v19 }
 0x27f   :  { %5022 = vmatpush3.msra.mxu1 %v5912_v19 }
 0x280   :  { %5017 = vmatmul.mubr.msk.f32.gmra.mxu1 %vm187_vm1, %v4292_v60  ;;  %5023 = vmatprep.subr.mxu1 %v5919_v20 }
 0x281   :  { %5024 = vmatpush3.msra.mxu1 %v5919_v20 }
 0x282   :  { %5025 = vmatprep.subr.mxu1 %v5926_v21 }
 0x283   :  { %5026 = vmatpush3.msra.mxu1 %v5926_v21 }
 0x284   :  { %5027 = vmatprep.subr.mxu1 %v5933_v22 }
 0x285   :  { %5028 = vmatpush3.msra.mxu1 %v5933_v22 }
 0x286   :  { %5029 = vmatprep.subr.mxu1 %v5940_v23 }
 0x287   :  { %5030 = vmatpush3.msra.mxu1 %v5940_v23 }
 0x288   :  { %5031 = vmatprep.subr.mxu1 %v5947_v24 }
 0x289   :  { %5032 = vmatpush3.msra.mxu1 %v5947_v24 }
 0x28a   :  { %5033 = vmatprep.subr.mxu1 %v5954_v25 }
 0x28b   :  { %5034 = vmatpush3.msra.mxu1 %v5954_v25 }
 0x28c   :  { %5063 = vmatprep.subr.mxu1 %v6031_v55 }
 0x334   :  { %v4983_v62 = vpop.f32.mrf.mxu1 }
 0x335   :  { %v579_v63 = vadd.f32 %v4983_v62, %v6166_v61 }
 0x336   :  { %v573_v3 = vpop.f32.mrf.mxu1 }
 0x337   :  { %v593_v9 = vmax.f32 %v579_v63, 0.0  ;;  %v574_v11 = vadd.f32 %v6166_v61, %v573_v3 }
 0x338   :  { %v4986_v13 = vpop.f32.mrf.mxu1 }
 0x339   :  { %597 = vst.msk [vmem:[#allocation2 + $0x8] sm:$0xff] %vm89_vm0, %v593_v9  ;;  %v592_v14 = vmax.f32 %v574_v11, 0.0  ;;  %v589_v15 = vadd.f32 %v4986_v13, %v6166_v61 }
 0x33a   :  { %v583_v16 = vpop.f32.mrf.mxu1 }
 0x33b   :  { %596 = vst.msk [vmem:[#allocation2] sm:$0xff] %vm89_vm0, %v592_v14  ;;  %v595_v17 = vmax.f32 %v589_v15, 0.0  ;;  %v584_v36 = vadd.f32 %v6166_v61, %v583_v16  ;;  %5003 = vmatprep.mubr.msk.f32.mxu0 %vm89_vm0, %v592_v14 }
 0x33c   :  { %5004 = vmatmul.mubr.msk.f32.vlgmr.msra.gmra.mxu0 %vm89_vm0, %v593_v9  ;;  %v5015_v38 = vpop.f32.mrf.mxu1 }
 0x33d   :  { %599 = vst.msk [vmem:[#allocation2 + $0x18] sm:$0xff] %vm89_vm0, %v595_v17  ;;  %v594_v37 = vmax.f32 %v584_v36, 0.0  ;;  %5042 = vmatpush3.msra.mxu0 %v5961_v26 }
 0x33e   :  { %5043 = vmatprep.subr.mxu0 %v5966_v27  ;;  %v780_v39 = vpop.f32.mrf.mxu1 }
 0x33f   :  { %598 = vst.msk [vmem:[#allocation2 + $0x10] sm:$0xff] %vm89_vm0, %v594_v37  ;;  %5006 = vmatprep.mubr.msk.f32.mxu0 %vm89_vm0, %v594_v37  ;;  %5044 = vmatpush3.msra.mxu0 %v5966_v27 }
 0x340   :  { %5007 = vmatmul.mubr.msk.f32.gmra.mxu0 %vm89_vm0, %v595_v17  ;;  %5045 = vmatprep.subr.mxu0 %v5973_v28  ;;  %v5018_v43 = vpop.f32.mrf.mxu1 }
 0x341   :  { %5046 = vmatpush3.msra.mxu0 %v5973_v28 }
 0x342   :  { %5047 = vmatprep.subr.mxu0 %v5980_v29  ;;  %v790_v49 = vpop.f32.mrf.mxu1 }
 0x343   :  { %5048 = vmatpush3.msra.mxu0 %v5980_v29 }
 0x344   :  { %5049 = vmatprep.subr.mxu0 %v6002_v51 }
 0x345   :  { %5050 = vmatpush3.msra.mxu0 %v6002_v51 }
 0x346   :  { %5051 = vmatprep.subr.mxu0 %v6009_v52 }
 0x347   :  { %5052 = vmatpush3.msra.mxu0 %v6009_v52 }
 0x348   :  { %5053 = vmatprep.subr.mxu0 %v6016_v53 }
 0x349   :  { %5054 = vmatpush3.msra.mxu0 %v6016_v53 }
 0x34a   :  { %5055 = vmatprep.subr.mxu0 %v6023_v54 }
 0x34b   :  { %5056 = vmatpush3.msra.mxu0 %v6023_v54 }
 0x34c   :  { %5085 = vmatprep.subr.mxu0 %v5803_v0 }
 0x3fc   :  { %v5005_v40 = vpop.f32.mrf.mxu0 }
 0x3fd   :  { %v786_v41 = vadd.f32 %v5015_v38, %v5005_v40 }
 0x3fe   :  { %v683_v42 = vpop.f32.mrf.mxu0 }
 0x3ff   :  { %v781_v44 = vadd.f32 %v780_v39, %v683_v42  ;;  %v800_v45 = vadd.f32 %v5989_v35, %v786_v41 }
 0x400   :  { %v5008_v46 = vpop.f32.mrf.mxu0 }
 0x401   :  { %v799_v47 = vadd.f32 %v5989_v35, %v781_v44  ;;  %v796_v48 = vadd.f32 %v5018_v43, %v5008_v46  ;;  %v804_v63 = vmax.f32 %v800_v45, 0.0 }
 0x402   :  { %v693_v50 = vpop.f32.mrf.mxu0 }
 0x403   :  { %v803_v60 = vmax.f32 %v799_v47, 0.0  ;;  %v791_v62 = vadd.f32 %v790_v49, %v693_v50  ;;  %v802_v3 = vadd.f32 %v5989_v35, %v796_v48 }
 0x405   :  { %v801_v9 = vadd.f32 %v5989_v35, %v791_v62  ;;  %5035 = vmatprep.mubr.msk.f32.mxu1 %vm89_vm0, %v803_v60  ;;  %v806_v13 = vmax.f32 %v802_v3, 0.0 }
 0x406   :  { %5036 = vmatmul.mubr.msk.f32.vlgmr.msra.gmra.mxu1 %vm89_vm0, %v804_v63 }
 0x407   :  { %v805_v11 = vmax.f32 %v801_v9, 0.0  ;;  %5064 = vmatpush3.msra.mxu1 %v6031_v55 }
 0x408   :  { %5065 = vmatprep.subr.mxu1 %v6036_v56 }
 0x409   :  { %5038 = vmatprep.mubr.msk.f32.mxu1 %vm89_vm0, %v805_v11  ;;  %5066 = vmatpush3.msra.mxu1 %v6036_v56  ;;  %v4313_v11 = vld [vmem:[%s7166_s0 + $0x40] sm:$0xff] }
 0x40a   :  { %5039 = vmatmul.mubr.msk.f32.gmra.mxu1 %vm89_vm0, %v806_v13  ;;  %5067 = vmatprep.subr.mxu1 %v6043_v57  ;;  %v4314_v13 = vld [vmem:[%s7166_s0 + $0x48] sm:$0xff] }
 0x40b   :  { %5068 = vmatpush3.msra.mxu1 %v6043_v57 }
 0x40c   :  { %5069 = vmatprep.subr.mxu1 %v6050_v58 }
 0x40d   :  { %5070 = vmatpush3.msra.mxu1 %v6050_v58 }
 0x40e   :  { %5071 = vmatprep.subr.mxu1 %v6088_v30 }
 0x40f   :  { %5072 = vmatpush3.msra.mxu1 %v6088_v30 }
 0x410   :  { %5073 = vmatprep.subr.mxu1 %v6095_v31 }
 0x411   :  { %5074 = vmatpush3.msra.mxu1 %v6095_v31 }
 0x412   :  { %5075 = vmatprep.subr.mxu1 %v6102_v32 }
 0x413   :  { %5076 = vmatpush3.msra.mxu1 %v6102_v32 }
 0x414   :  { %5077 = vmatprep.subr.mxu1 %v6109_v33 }
 0x415   :  { %5078 = vmatpush3.msra.mxu1 %v6109_v33 }
 0x416   :  { %5107 = vmatprep.subr.mxu1 %v5864_v10 }
 0x4c6   :  { %v5037_v14 = vpop.f32.mrf.mxu1 }
 0x4c7   :  { %v891_v15 = vadd.f32 %v5037_v14, %v6059_v59  ;;  %v4315_v14 = vld [vmem:[%s7166_s0 + $0x50] sm:$0xff] }
 0x4c8   :  { %v885_v16 = vpop.f32.mrf.mxu1 }
 0x4c9   :  { %v886_v17 = vadd.f32 %v6059_v59, %v885_v16  ;;  %v905_v38 = vmax.f32 %v891_v15, 0.0  ;;  %v4316_v15 = vld [vmem:[%s7166_s0 + $0x58] sm:$0xff] }
 0x4ca   :  { %v5040_v36 = vpop.f32.mrf.mxu1 }
 0x4cb   :  { %v904_v37 = vmax.f32 %v886_v17, 0.0  ;;  %v901_v39 = vadd.f32 %v5040_v36, %v6059_v59 }
 0x4cc   :  { %v895_v40 = vpop.f32.mrf.mxu1 }
 0x4cd   :  { %v896_v41 = vadd.f32 %v6059_v59, %v895_v40  ;;  %5057 = vmatprep.mubr.msk.f32.mxu0 %vm89_vm0, %v904_v37  ;;  %v907_v43 = vmax.f32 %v901_v39, 0.0 }
 0x4ce   :  { %5058 = vmatmul.mubr.msk.f32.vlgmr.msra.gmra.mxu0 %vm89_vm0, %v905_v38 }
 0x4cf   :  { %v906_v42 = vmax.f32 %v896_v41, 0.0  ;;  %5086 = vmatpush3.msra.mxu0 %v5803_v0 }
 0x4d0   :  { %5087 = vmatprep.subr.mxu0 %v5808_v1 }
 0x4d1   :  { %5060 = vmatprep.mubr.msk.f32.mxu0 %vm89_vm0, %v906_v42  ;;  %5088 = vmatpush3.msra.mxu0 %v5808_v1 }
 0x4d2   :  { %5061 = vmatmul.mubr.msk.f32.gmra.mxu0 %vm89_vm0, %v907_v43  ;;  %5089 = vmatprep.subr.mxu0 %v5815_v2 }
 0x4d3   :  { %5090 = vmatpush3.msra.mxu0 %v5815_v2 }
 0x4d4   :  { %5091 = vmatprep.subr.mxu0 %v5826_v4 }
 0x4d5   :  { %5092 = vmatpush3.msra.mxu0 %v5826_v4 }
 0x4d6   :  { %5093 = vmatprep.subr.mxu0 %v5833_v5 }
 0x4d7   :  { %5094 = vmatpush3.msra.mxu0 %v5833_v5 }
 0x4d8   :  { %5095 = vmatprep.subr.mxu0 %v5840_v6 }
 0x4d9   :  { %5096 = vmatpush3.msra.mxu0 %v5840_v6 }
 0x4da   :  { %5097 = vmatprep.subr.mxu0 %v5847_v7 }
 0x4db   :  { %5098 = vmatpush3.msra.mxu0 %v5847_v7 }
 0x4dc   :  { %5099 = vmatprep.subr.mxu0 %v5854_v8 }
 0x4dd   :  { %5100 = vmatpush3.msra.mxu0 %v5854_v8 }
 0x4de   :  { %5117 = vmatprep.subr.mxu0 %v5905_v18 }
 0x58e   :  { %v5059_v44 = vpop.f32.mrf.mxu0 }
 0x58f   :  { %v992_v45 = vadd.f32 %v5059_v44, %v6117_v34 }
 0x590   :  { %v986_v46 = vpop.f32.mrf.mxu0 }
 0x591   :  { %v987_v47 = vadd.f32 %v6117_v34, %v986_v46  ;;  %v1006_v50 = vmax.f32 %v992_v45, 0.0 }
 0x592   :  { %v5062_v48 = vpop.f32.mrf.mxu0 }
 0x593   :  { %v1005_v49 = vmax.f32 %v987_v47, 0.0  ;;  %v1002_v60 = vadd.f32 %v5062_v48, %v6117_v34 }
 0x594   :  { %v996_v62 = vpop.f32.mrf.mxu0 }
 0x595   :  { %v997_v63 = vadd.f32 %v6117_v34, %v996_v62  ;;  %5079 = vmatprep.mubr.msk.f32.mxu1 %vm89_vm0, %v1005_v49  ;;  %v1008_v9 = vmax.f32 %v1002_v60, 0.0 }
 0x596   :  { %5080 = vmatmul.mubr.msk.f32.vlgmr.msra.gmra.mxu1 %vm89_vm0, %v1006_v50 }
 0x597   :  { %v1007_v3 = vmax.f32 %v997_v63, 0.0  ;;  %5108 = vmatpush3.msra.mxu1 %v5864_v10 }
 0x598   :  { %5109 = vmatprep.subr.mxu1 %v5874_v12 }
 0x599   :  { %5082 = vmatprep.mubr.msk.f32.mxu1 %vm89_vm0, %v1007_v3  ;;  %5110 = vmatpush3.msra.mxu1 %v5874_v12 }
 0x59a   :  { %5083 = vmatmul.mubr.msk.f32.gmra.mxu1 %vm89_vm0, %v1008_v9  ;;  %5139 = vmatprep.subr.mxu1 %v5961_v26 }
 0x59b   :  { %5111 = vmatprep.mubr.msk.f32.mxu1 %vm187_vm1, %v4313_v11 }
 0x59e   :  { %5112 = vmatmul.mubr.msk.f32.vlgmr.msra.gmra.mxu1 %vm187_vm1, %v4314_v13 }
 0x59f   :  { %5140 = vmatpush3.msra.mxu1 %v5961_v26  ;;  %5114 = vmatprep.mubr.msk.f32.mxu1 %vm187_vm1, %v4315_v14 }
 0x5a0   :  { %5141 = vmatprep.subr.mxu1 %v5966_v27 }
 0x5a1   :  { %5142 = vmatpush3.msra.mxu1 %v5966_v27 }
 0x5a2   :  { %5115 = vmatmul.mubr.msk.f32.gmra.mxu1 %vm187_vm1, %v4316_v15  ;;  %5143 = vmatprep.subr.mxu1 %v5973_v28 }
 0x5a3   :  { %5144 = vmatpush3.msra.mxu1 %v5973_v28 }
 0x5a4   :  { %5145 = vmatprep.subr.mxu1 %v5980_v29 }
 0x5a5   :  { %5146 = vmatpush3.msra.mxu1 %v5980_v29 }
 0x5a6   :  { %5147 = vmatprep.subr.mxu1 %v6002_v51 }
 0x5a7   :  { %5148 = vmatpush3.msra.mxu1 %v6002_v51 }
 0x5a8   :  { %5149 = vmatprep.subr.mxu1 %v6009_v52 }
 0x5a9   :  { %5150 = vmatpush3.msra.mxu1 %v6009_v52 }
 0x5aa   :  { %5151 = vmatprep.subr.mxu1 %v6016_v53 }
 0x5ab   :  { %5152 = vmatpush3.msra.mxu1 %v6016_v53 }
 0x5ac   :  { %5153 = vmatprep.subr.mxu1 %v6023_v54 }
 0x5ad   :  { %5154 = vmatpush3.msra.mxu1 %v6023_v54 }
 0x5ae   :  { %5183 = vmatprep.subr.mxu1 %v5803_v0 }
 0x656   :  { %v5081_v16 = vpop.f32.mrf.mxu1 }
 0x657   :  { %v1093_v17 = vadd.f32 %v5081_v16, %v6166_v61 }
 0x658   :  { %v1087_v36 = vpop.f32.mrf.mxu1 }
 0x659   :  { %v1107_v37 = vmax.f32 %v1093_v17, 0.0  ;;  %v1088_v38 = vadd.f32 %v6166_v61, %v1087_v36 }
 0x65a   :  { %v5084_v39 = vpop.f32.mrf.mxu1 }
 0x65b   :  { %1112 = vst.msk [vmem:[#allocation2 + $0x28] sm:$0xff] %vm89_vm0, %v1107_v37  ;;  %v1106_v40 = vmax.f32 %v1088_v38, 0.0  ;;  %v1103_v41 = vadd.f32 %v5084_v39, %v6166_v61 }
 0x65c   :  { %v1097_v42 = vpop.f32.mrf.mxu1 }
 0x65d   :  { %1111 = vst.msk [vmem:[#allocation2 + $0x20] sm:$0xff] %vm89_vm0, %v1106_v40  ;;  %v1109_v43 = vmax.f32 %v1103_v41, 0.0  ;;  %v1098_v44 = vadd.f32 %v6166_v61, %v1097_v42  ;;  %5101 = vmatprep.mubr.msk.f32.mxu0 %vm89_vm0, %v1106_v40 }
 0x65e   :  { %5102 = vmatmul.mubr.msk.f32.vlgmr.msra.gmra.mxu0 %vm89_vm0, %v1107_v37  ;;  %v5113_v46 = vpop.f32.mrf.mxu1 }
 0x65f   :  { %1114 = vst.msk [vmem:[#allocation2 + $0x38] sm:$0xff] %vm89_vm0, %v1109_v43  ;;  %v1108_v45 = vmax.f32 %v1098_v44, 0.0  ;;  %5118 = vmatpush3.msra.mxu0 %v5905_v18 }
 0x660   :  { %5119 = vmatprep.subr.mxu0 %v5912_v19  ;;  %v1295_v47 = vpop.f32.mrf.mxu1 }
 0x661   :  { %1113 = vst.msk [vmem:[#allocation2 + $0x30] sm:$0xff] %vm89_vm0, %v1108_v45  ;;  %5104 = vmatprep.mubr.msk.f32.mxu0 %vm89_vm0, %v1108_v45  ;;  %5120 = vmatpush3.msra.mxu0 %v5912_v19 }
 0x662   :  { %5105 = vmatmul.mubr.msk.f32.gmra.mxu0 %vm89_vm0, %v1109_v43  ;;  %5121 = vmatprep.subr.mxu0 %v5919_v20  ;;  %v5116_v60 = vpop.f32.mrf.mxu1 }
 0x663   :  { %5122 = vmatpush3.msra.mxu0 %v5919_v20 }
 0x664   :  { %5123 = vmatprep.subr.mxu0 %v5926_v21  ;;  %v1305_v13 = vpop.f32.mrf.mxu1 }
 0x665   :  { %5124 = vmatpush3.msra.mxu0 %v5926_v21 }
 0x666   :  { %5125 = vmatprep.subr.mxu0 %v5933_v22 }
 0x667   :  { %5126 = vmatpush3.msra.mxu0 %v5933_v22 }
 0x668   :  { %5127 = vmatprep.subr.mxu0 %v5940_v23 }
 0x669   :  { %5128 = vmatpush3.msra.mxu0 %v5940_v23 }
 0x66a   :  { %5129 = vmatprep.subr.mxu0 %v5947_v24 }
 0x66b   :  { %5130 = vmatpush3.msra.mxu0 %v5947_v24 }
 0x66c   :  { %5131 = vmatprep.subr.mxu0 %v5954_v25 }
 0x66d   :  { %5132 = vmatpush3.msra.mxu0 %v5954_v25 }
 0x66e   :  { %5161 = vmatprep.subr.mxu0 %v6031_v55 }
 0x71e   :  { %v5103_v48 = vpop.f32.mrf.mxu0 }
 0x71f   :  { %v1301_v49 = vadd.f32 %v5113_v46, %v5103_v48 }
 0x720   :  { %v1198_v50 = vpop.f32.mrf.mxu0 }
 0x721   :  { %v1296_v62 = vadd.f32 %v1295_v47, %v1198_v50  ;;  %v1315_v63 = vadd.f32 %v5989_v35, %v1301_v49 }
 0x722   :  { %v5106_v3 = vpop.f32.mrf.mxu0 }
 0x723   :  { %v1314_v9 = vadd.f32 %v5989_v35, %v1296_v62  ;;  %v1311_v11 = vadd.f32 %v5116_v60, %v5106_v3  ;;  %v1319_v17 = vmax.f32 %v1315_v63, 0.0 }
 0x724   :  { %v1208_v14 = vpop.f32.mrf.mxu0 }
 0x725   :  { %v1318_v15 = vmax.f32 %v1314_v9, 0.0  ;;  %v1306_v16 = vadd.f32 %v1305_v13, %v1208_v14  ;;  %v1317_v36 = vadd.f32 %v5989_v35, %v1311_v11  ;;  %v4337_v11 = vld [vmem:[%s7166_s0 + $0x60] sm:$0xff]  ;;  %v4340_v13 = vld [vmem:[%s7166_s0 + $0x78] sm:$0xff] }
 0x727   :  { %v1316_v37 = vadd.f32 %v5989_v35, %v1306_v16  ;;  %5133 = vmatprep.mubr.msk.f32.mxu0 %vm89_vm0, %v1318_v15  ;;  %v1321_v39 = vmax.f32 %v1317_v36, 0.0 }
 0x728   :  { %5134 = vmatmul.mubr.msk.f32.vlgmr.msra.gmra.mxu0 %vm89_vm0, %v1319_v17 }
 0x729   :  { %v1320_v38 = vmax.f32 %v1316_v37, 0.0  ;;  %5162 = vmatpush3.msra.mxu0 %v6031_v55 }
 0x72a   :  { %5163 = vmatprep.subr.mxu0 %v6036_v56 }
 0x72b   :  { %5136 = vmatprep.mubr.msk.f32.mxu0 %vm89_vm0, %v1320_v38  ;;  %5164 = vmatpush3.msra.mxu0 %v6036_v56 }
 0x72c   :  { %5137 = vmatmul.mubr.msk.f32.gmra.mxu0 %vm89_vm0, %v1321_v39  ;;  %5165 = vmatprep.subr.mxu0 %v6043_v57 }
 0x72d   :  { %5166 = vmatpush3.msra.mxu0 %v6043_v57 }
 0x72e   :  { %5167 = vmatprep.subr.mxu0 %v6050_v58 }
 0x72f   :  { %5168 = vmatpush3.msra.mxu0 %v6050_v58 }
 0x730   :  { %5169 = vmatprep.subr.mxu0 %v6088_v30 }
 0x731   :  { %5170 = vmatpush3.msra.mxu0 %v6088_v30 }
 0x732   :  { %5171 = vmatprep.subr.mxu0 %v6095_v31 }
 0x733   :  { %5172 = vmatpush3.msra.mxu0 %v6095_v31 }
 0x734   :  { %5173 = vmatprep.subr.mxu0 %v6102_v32 }
 0x735   :  { %5174 = vmatpush3.msra.mxu0 %v6102_v32 }
 0x736   :  { %5175 = vmatprep.subr.mxu0 %v6109_v33 }
 0x737   :  { %5176 = vmatpush3.msra.mxu0 %v6109_v33 }
 0x738   :  { %5205 = vmatprep.subr.mxu0 %v5864_v10 }
 0x7e8   :  { %v5135_v40 = vpop.f32.mrf.mxu0 }
 0x7e9   :  { %v1406_v41 = vadd.f32 %v5135_v40, %v6059_v59 }
 0x7ea   :  { %v1400_v42 = vpop.f32.mrf.mxu0 }
 0x7eb   :  { %v1401_v43 = vadd.f32 %v6059_v59, %v1400_v42  ;;  %v1420_v46 = vmax.f32 %v1406_v41, 0.0 }
 0x7ec   :  { %v5138_v44 = vpop.f32.mrf.mxu0 }
 0x7ed   :  { %v1419_v45 = vmax.f32 %v1401_v43, 0.0  ;;  %v1416_v47 = vadd.f32 %v5138_v44, %v6059_v59 }
 0x7ee   :  { %v1410_v48 = vpop.f32.mrf.mxu0 }
 0x7ef   :  { %v1411_v49 = vadd.f32 %v6059_v59, %v1410_v48  ;;  %5155 = vmatprep.mubr.msk.f32.mxu1 %vm89_vm0, %v1419_v45  ;;  %v1422_v60 = vmax.f32 %v1416_v47, 0.0 }
 0x7f0   :  { %5156 = vmatmul.mubr.msk.f32.vlgmr.msra.gmra.mxu1 %vm89_vm0, %v1420_v46 }
 0x7f1   :  { %v1421_v50 = vmax.f32 %v1411_v49, 0.0  ;;  %5184 = vmatpush3.msra.mxu1 %v5803_v0 }
 0x7f2   :  { %5185 = vmatprep.subr.mxu1 %v5808_v1 }
 0x7f3   :  { %5158 = vmatprep.mubr.msk.f32.mxu1 %vm89_vm0, %v1421_v50  ;;  %5186 = vmatpush3.msra.mxu1 %v5808_v1 }
 0x7f4   :  { %5159 = vmatmul.mubr.msk.f32.gmra.mxu1 %vm89_vm0, %v1422_v60  ;;  %5187 = vmatprep.subr.mxu1 %v5815_v2 }
 0x7f5   :  { %5188 = vmatpush3.msra.mxu1 %v5815_v2 }
 0x7f6   :  { %5189 = vmatprep.subr.mxu1 %v5826_v4 }
 0x7f7   :  { %5190 = vmatpush3.msra.mxu1 %v5826_v4 }
 0x7f8   :  { %5191 = vmatprep.subr.mxu1 %v5833_v5 }
 0x7f9   :  { %5192 = vmatpush3.msra.mxu1 %v5833_v5 }
 0x7fa   :  { %5193 = vmatprep.subr.mxu1 %v5840_v6 }
 0x7fb   :  { %5194 = vmatpush3.msra.mxu1 %v5840_v6 }
 0x7fc   :  { %5195 = vmatprep.subr.mxu1 %v5847_v7 }
 0x7fd   :  { %5196 = vmatpush3.msra.mxu1 %v5847_v7 }
 0x7fe   :  { %5197 = vmatprep.subr.mxu1 %v5854_v8 }
 0x7ff   :  { %5198 = vmatpush3.msra.mxu1 %v5854_v8 }
 0x800   :  { %5215 = vmatprep.subr.mxu1 %v5905_v18 }
 0x8b0   :  { %v5157_v0 = vpop.f32.mrf.mxu1 }
 0x8b1   :  { %v1507_v1 = vadd.f32 %v5157_v0, %v6117_v34 }
 0x8b2   :  { %v1501_v2 = vpop.f32.mrf.mxu1 }
 0x8b3   :  { %v1502_v4 = vadd.f32 %v6117_v34, %v1501_v2  ;;  %v1521_v63 = vmax.f32 %v1507_v1, 0.0  ;;  %v6480_v1 = vld [vmem:[%s7169_s3 + $0x30] sm:$0xff]  ;;  %v6496_v2 = vld [vmem:[%s7169_s3 + $0x20] sm:$0xff] }
 0x8b4   :  { %v5160_v5 = vpop.f32.mrf.mxu1 }
 0x8b5   :  { %v1520_v62 = vmax.f32 %v1502_v4, 0.0  ;;  %v1517_v6 = vadd.f32 %v5160_v5, %v6117_v34  ;;  %v6503_v4 = vld [vmem:[%s7169_s3 + $0x18] sm:$0xff]  ;;  %v6510_v5 = vld [vmem:[%s7169_s3 + $0x10] sm:$0xff] }
 0x8b6   :  { %v1511_v3 = vpop.f32.mrf.mxu1 }
 0x8b7   :  { %v1512_v7 = vadd.f32 %v6117_v34, %v1511_v3  ;;  %5177 = vmatprep.mubr.msk.f32.mxu0 %vm89_vm0, %v1520_v62  ;;  %v1523_v9 = vmax.f32 %v1517_v6, 0.0  ;;  %v6517_v62 = vld [vmem:[%s7169_s3 + $0x8] sm:$0xff]  ;;  %v6531_v6 = vld [vmem:[%s7169_s3 + $0x78] sm:$0xff] }
 0x8b8   :  { %5178 = vmatmul.mubr.msk.f32.vlgmr.msra.gmra.mxu0 %vm89_vm0, %v1521_v63  ;;  %v6524_v63 = vld [vmem:[%s7169_s3] sm:$0xff] }
 0x8b9   :  { %v1522_v8 = vmax.f32 %v1512_v7, 0.0  ;;  %5206 = vmatpush3.msra.mxu0 %v5864_v10  ;;  %v4338_v10 = vld [vmem:[%s7166_s0 + $0x68] sm:$0xff] }
 0x8ba   :  { %5207 = vmatprep.subr.mxu0 %v5874_v12 }
 0x8bb   :  { %5180 = vmatprep.mubr.msk.f32.mxu0 %vm89_vm0, %v1522_v8  ;;  %5208 = vmatpush3.msra.mxu0 %v5874_v12  ;;  %v4339_v12 = vld [vmem:[%s7166_s0 + $0x70] sm:$0xff] }
 0x8bc   :  { %5181 = vmatmul.mubr.msk.f32.gmra.mxu0 %vm89_vm0, %v1523_v9  ;;  %5237 = vmatprep.subr.mxu0 %v5961_v26 }
 0x8bd   :  { %5209 = vmatprep.mubr.msk.f32.mxu0 %vm187_vm1, %v4337_v11 }
 0x8c0   :  { %5210 = vmatmul.mubr.msk.f32.vlgmr.msra.gmra.mxu0 %vm187_vm1, %v4338_v10 }
 0x8c1   :  { %5238 = vmatpush3.msra.mxu0 %v5961_v26  ;;  %5212 = vmatprep.mubr.msk.f32.mxu0 %vm187_vm1, %v4339_v12  ;;  %v6410_v26 = vld [vmem:[%s7169_s3 + $0x38] sm:$0xff] }
 0x8c2   :  { %5239 = vmatprep.subr.mxu0 %v5966_v27 }
 0x8c3   :  { %5240 = vmatpush3.msra.mxu0 %v5966_v27 }
 0x8c4   :  { %5213 = vmatmul.mubr.msk.f32.gmra.mxu0 %vm187_vm1, %v4340_v13  ;;  %5241 = vmatprep.subr.mxu0 %v5973_v28 }
 0x8c5   :  { %5242 = vmatpush3.msra.mxu0 %v5973_v28 }
 0x8c6   :  { %5243 = vmatprep.subr.mxu0 %v5980_v29 }
 0x8c7   :  { %5244 = vmatpush3.msra.mxu0 %v5980_v29 }
 0x8c8   :  { %5245 = vmatprep.subr.mxu0 %v6002_v51 }
 0x8c9   :  { %5246 = vmatpush3.msra.mxu0 %v6002_v51 }
 0x8ca   :  { %5247 = vmatprep.subr.mxu0 %v6009_v52 }
 0x8cb   :  { %5248 = vmatpush3.msra.mxu0 %v6009_v52 }
 0x8cc   :  { %5249 = vmatprep.subr.mxu0 %v6016_v53 }
 0x8cd   :  { %5250 = vmatpush3.msra.mxu0 %v6016_v53 }
 0x8ce   :  { %5251 = vmatprep.subr.mxu0 %v6023_v54 }
 0x8cf   :  { %5252 = vmatpush3.msra.mxu0 %v6023_v54 }
 0x8d0   :  { %5281 = vmatprep.subr.mxu0 %v6410_v26 }
 0x978   :  { %v5179_v27 = vpop.f32.mrf.mxu0 }
 0x979   :  { %v1608_v28 = vadd.f32 %v5179_v27, %v6166_v61 }
 0x97a   :  { %v1602_v29 = vpop.f32.mrf.mxu0 }
 0x97b   :  { %v1622_v51 = vmax.f32 %v1608_v28, 0.0  ;;  %v1603_v52 = vadd.f32 %v6166_v61, %v1602_v29 }
 0x97c   :  { %v5182_v14 = vpop.f32.mrf.mxu0 }
 0x97d   :  { %1627 = vst.msk [vmem:[#allocation2 + $0x48] sm:$0xff] %vm89_vm0, %v1622_v51  ;;  %v1621_v53 = vmax.f32 %v1603_v52, 0.0  ;;  %v1618_v54 = vadd.f32 %v5182_v14, %v6166_v61  ;;  %v6544_v52 = vld [vmem:[%s7168_s2] sm:$0xff] }
 0x97e   :  { %v1612_v15 = vpop.f32.mrf.mxu0  ;;  %v4361_v14 = vld [vmem:[%s7166_s0 + $0x80] sm:$0xff] }
 0x97f   :  { %1626 = vst.msk [vmem:[#allocation2 + $0x40] sm:$0xff] %vm89_vm0, %v1621_v53  ;;  %v1624_v16 = vmax.f32 %v1618_v54, 0.0  ;;  %v1613_v17 = vadd.f32 %v6166_v61, %v1612_v15  ;;  %5199 = vmatprep.mubr.msk.f32.mxu1 %vm89_vm0, %v1621_v53  ;;  %v4362_v53 = vld [vmem:[%s7166_s0 + $0x88] sm:$0xff]  ;;  %v4363_v54 = vld [vmem:[%s7166_s0 + $0x90] sm:$0xff] }
 0x980   :  { %5200 = vmatmul.mubr.msk.f32.vlgmr.msra.gmra.mxu1 %vm89_vm0, %v1622_v51  ;;  %v6571_v15 = vld [vmem:[%s7169_s3 + $0xb0] sm:$0xff] }
 0x981   :  { %1629 = vst.msk [vmem:[#allocation2 + $0x58] sm:$0xff] %vm89_vm0, %v1624_v16  ;;  %v1623_v36 = vmax.f32 %v1613_v17, 0.0  ;;  %5216 = vmatpush3.msra.mxu1 %v5905_v18  ;;  %v5211_v18 = vpop.f32.mrf.mxu0  ;;  %v6583_v17 = vld [vmem:[%s7169_s3 + $0xa8] sm:$0xff] }
 0x982   :  { %5217 = vmatprep.subr.mxu1 %v5912_v19 }
 0x983   :  { %1628 = vst.msk [vmem:[#allocation2 + $0x50] sm:$0xff] %vm89_vm0, %v1623_v36  ;;  %5202 = vmatprep.mubr.msk.f32.mxu1 %vm89_vm0, %v1623_v36  ;;  %5218 = vmatpush3.msra.mxu1 %v5912_v19  ;;  %v1810_v19 = vpop.f32.mrf.mxu0  ;;  %v6590_v36 = vld [vmem:[%s7169_s3 + $0xa0] sm:$0xff] }
 0x984   :  { %5203 = vmatmul.mubr.msk.f32.gmra.mxu1 %vm89_vm0, %v1624_v16  ;;  %5219 = vmatprep.subr.mxu1 %v5919_v20  ;;  %v4364_v16 = vld [vmem:[%s7166_s0 + $0x98] sm:$0xff] }
 0x985   :  { %5220 = vmatpush3.msra.mxu1 %v5919_v20 }
 0x986   :  { %5221 = vmatprep.subr.mxu1 %v5926_v21 }
 0x987   :  { %5222 = vmatpush3.msra.mxu1 %v5926_v21 }
 0x988   :  { %5223 = vmatprep.subr.mxu1 %v5933_v22 }
 0x989   :  { %5224 = vmatpush3.msra.mxu1 %v5933_v22  ;;  %v5214_v22 = vpop.f32.mrf.mxu0 }
 0x98a   :  { %5225 = vmatprep.subr.mxu1 %v5940_v23 }
 0x98b   :  { %5226 = vmatpush3.msra.mxu1 %v5940_v23 }
 0x98c   :  { %5227 = vmatprep.subr.mxu1 %v5947_v24 }
 0x98d   :  { %5228 = vmatpush3.msra.mxu1 %v5947_v24  ;;  %v1820_v24 = vpop.f32.mrf.mxu0 }
 0x98e   :  { %5229 = vmatprep.subr.mxu1 %v5954_v25 }
 0x98f   :  { %5230 = vmatpush3.msra.mxu1 %v5954_v25 }
 0x990   :  { %5259 = vmatprep.subr.mxu1 %v6031_v55 }
 0xa40   :  { %v5201_v20 = vpop.f32.mrf.mxu1 }
 0xa41   :  { %v1816_v21 = vadd.f32 %v5211_v18, %v5201_v20  ;;  %v6597_v18 = vld [vmem:[%s7169_s3 + $0x98] sm:$0xff]  ;;  %v6611_v20 = vld [vmem:[%s7169_s3 + $0x88] sm:$0xff] }
 0xa42   :  { %v1713_v37 = vpop.f32.mrf.mxu1 }
 0xa43   :  { %v1811_v38 = vadd.f32 %v1810_v19, %v1713_v37  ;;  %v1830_v39 = vadd.f32 %v5989_v35, %v1816_v21  ;;  %v6604_v19 = vld [vmem:[%s7169_s3 + $0x90] sm:$0xff]  ;;  %v6618_v21 = vld [vmem:[%s7169_s3 + $0x80] sm:$0xff] }
 0xa44   :  { %v5204_v23 = vpop.f32.mrf.mxu1 }
 0xa45   :  { %v1829_v40 = vadd.f32 %v5989_v35, %v1811_v38  ;;  %v1826_v41 = vadd.f32 %v5214_v22, %v5204_v23  ;;  %v1834_v25 = vmax.f32 %v1830_v39, 0.0 }
 0xa46   :  { %v1723_v42 = vpop.f32.mrf.mxu1 }
 0xa47   :  { %v1833_v43 = vmax.f32 %v1829_v40, 0.0  ;;  %v1821_v44 = vadd.f32 %v1820_v24, %v1723_v42  ;;  %v1832_v45 = vadd.f32 %v5989_v35, %v1826_v41 }
 0xa49   :  { %v1831_v46 = vadd.f32 %v5989_v35, %v1821_v44  ;;  %5231 = vmatprep.mubr.msk.f32.mxu1 %vm89_vm0, %v1833_v43  ;;  %v1836_v48 = vmax.f32 %v1832_v45, 0.0  ;;  %v6467_v35 = vld [vmem:[%s7168_s2 + $0x8] sm:$0xff]  ;;  %v6636_v45 = vld [vmem:[%s7169_s3 + $0x70] sm:$0xff] }
 0xa4a   :  { %5232 = vmatmul.mubr.msk.f32.vlgmr.msra.gmra.mxu1 %vm89_vm0, %v1834_v25 }
 0xa4b   :  { %v1835_v47 = vmax.f32 %v1831_v46, 0.0  ;;  %5260 = vmatpush3.msra.mxu1 %v6031_v55  ;;  %v6653_v46 = vld [vmem:[%s7169_s3 + $0x60] sm:$0xff] }
 0xa4c   :  { %5261 = vmatprep.subr.mxu1 %v6036_v56 }
 0xa4d   :  { %5234 = vmatprep.mubr.msk.f32.mxu1 %vm89_vm0, %v1835_v47  ;;  %5262 = vmatpush3.msra.mxu1 %v6036_v56  ;;  %v6660_v47 = vld [vmem:[%s7169_s3 + $0x58] sm:$0xff] }
 0xa4e   :  { %5235 = vmatmul.mubr.msk.f32.gmra.mxu1 %vm89_vm0, %v1836_v48  ;;  %5263 = vmatprep.subr.mxu1 %v6043_v57  ;;  %v6667_v48 = vld [vmem:[%s7169_s3 + $0x50] sm:$0xff] }
 0xa4f   :  { %5264 = vmatpush3.msra.mxu1 %v6043_v57 }
 0xa50   :  { %5265 = vmatprep.subr.mxu1 %v6050_v58 }
 0xa51   :  { %5266 = vmatpush3.msra.mxu1 %v6050_v58 }
 0xa52   :  { %5267 = vmatprep.subr.mxu1 %v6088_v30 }
 0xa53   :  { %5268 = vmatpush3.msra.mxu1 %v6088_v30 }
 0xa54   :  { %5269 = vmatprep.subr.mxu1 %v6095_v31 }
 0xa55   :  { %5270 = vmatpush3.msra.mxu1 %v6095_v31 }
 0xa56   :  { %5271 = vmatprep.subr.mxu1 %v6102_v32 }
 0xa57   :  { %5272 = vmatpush3.msra.mxu1 %v6102_v32 }
 0xa58   :  { %5273 = vmatprep.subr.mxu1 %v6109_v33 }
 0xa59   :  { %5274 = vmatpush3.msra.mxu1 %v6109_v33 }
 0xa5a   :  { %5303 = vmatprep.subr.mxu1 %v6467_v35 }
 0xb0a   :  { %v5233_v55 = vpop.f32.mrf.mxu1 }
 0xb0b   :  { %v1921_v56 = vadd.f32 %v5233_v55, %v6059_v59  ;;  %v6674_v55 = vld [vmem:[%s7169_s3 + $0x48] sm:$0xff] }
 0xb0c   :  { %v1915_v57 = vpop.f32.mrf.mxu1 }
 0xb0d   :  { %v1916_v58 = vadd.f32 %v6059_v59, %v1915_v57  ;;  %v1935_v32 = vmax.f32 %v1921_v56, 0.0  ;;  %v6681_v56 = vld [vmem:[%s7169_s3 + $0x40] sm:$0xff]  ;;  %v6688_v57 = vld [vmem:[%s7169_s3 + $0xf8] sm:$0xff] }
 0xb0e   :  { %v5236_v30 = vpop.f32.mrf.mxu1 }
 0xb0f   :  { %v1934_v31 = vmax.f32 %v1916_v58, 0.0  ;;  %v1931_v49 = vadd.f32 %v5236_v30, %v6059_v59 }
 0xb10   :  { %v1925_v50 = vpop.f32.mrf.mxu1 }
 0xb11   :  { %v1926_v33 = vadd.f32 %v6059_v59, %v1925_v50  ;;  %5253 = vmatprep.mubr.msk.f32.mxu0 %vm89_vm0, %v1934_v31  ;;  %v1937_v0 = vmax.f32 %v1931_v49, 0.0  ;;  %v6489_v59 = vld [vmem:[%s7169_s3 + $0x28] sm:$0xff] }
 0xb12   :  { %5254 = vmatmul.mubr.msk.f32.vlgmr.msra.gmra.mxu0 %vm89_vm0, %v1935_v32 }
 0xb13   :  { %v1936_v60 = vmax.f32 %v1926_v33, 0.0  ;;  %5282 = vmatpush3.msra.mxu0 %v6410_v26 }
 0xb14   :  { %5283 = vmatprep.subr.mxu0 %v6480_v1 }
 0xb15   :  { %5256 = vmatprep.mubr.msk.f32.mxu0 %vm89_vm0, %v1936_v60  ;;  %5284 = vmatpush3.msra.mxu0 %v6480_v1  ;;  %v6694_v60 = vld [vmem:[%s7170_s4] ss:$0 sm:$0xff] }
 0xb16   :  { %5257 = vmatmul.mubr.msk.f32.gmra.mxu0 %vm89_vm0, %v1937_v0  ;;  %5285 = vmatprep.subr.mxu0 %v6489_v59 }
 0xb17   :  { %5286 = vmatpush3.msra.mxu0 %v6489_v59 }
 0xb18   :  { %5287 = vmatprep.subr.mxu0 %v6496_v2 }
 0xb19   :  { %5288 = vmatpush3.msra.mxu0 %v6496_v2 }
 0xb1a   :  { %5289 = vmatprep.subr.mxu0 %v6503_v4 }
 0xb1b   :  { %5290 = vmatpush3.msra.mxu0 %v6503_v4 }
 0xb1c   :  { %5291 = vmatprep.subr.mxu0 %v6510_v5 }
 0xb1d   :  { %5292 = vmatpush3.msra.mxu0 %v6510_v5 }
 0xb1e   :  { %5293 = vmatprep.subr.mxu0 %v6517_v62 }
 0xb1f   :  { %5294 = vmatpush3.msra.mxu0 %v6517_v62 }
 0xb20   :  { %5295 = vmatprep.subr.mxu0 %v6524_v63 }
 0xb21   :  { %5296 = vmatpush3.msra.mxu0 %v6524_v63 }
 0xb22   :  { %5313 = vmatprep.subr.mxu0 %v6531_v6 }
 0xbd2   :  { %v5255_v3 = vpop.f32.mrf.mxu0 }
 0xbd3   :  { %v2022_v7 = vadd.f32 %v5255_v3, %v6117_v34 }
 0xbd4   :  { %v2016_v8 = vpop.f32.mrf.mxu0 }
 0xbd5   :  { %v2017_v9 = vadd.f32 %v6117_v34, %v2016_v8  ;;  %v2036_v12 = vmax.f32 %v2022_v7, 0.0 }
 0xbd6   :  { %v5258_v11 = vpop.f32.mrf.mxu0 }
 0xbd7   :  { %v2035_v10 = vmax.f32 %v2017_v9, 0.0  ;;  %v2032_v13 = vadd.f32 %v5258_v11, %v6117_v34 }
 0xbd8   :  { %v2026_v27 = vpop.f32.mrf.mxu0 }
 0xbd9   :  { %v2027_v28 = vadd.f32 %v6117_v34, %v2026_v27  ;;  %5275 = vmatprep.mubr.msk.f32.mxu1 %vm89_vm0, %v2035_v10  ;;  %v2038_v51 = vmax.f32 %v2032_v13, 0.0  ;;  %v6553_v34 = vld [vmem:[%s7169_s3 + $0xb8] sm:$0xff] }
 0xbda   :  { %5276 = vmatmul.mubr.msk.f32.vlgmr.msra.gmra.mxu1 %vm89_vm0, %v2036_v12 }
 0xbdb   :  { %v2037_v29 = vmax.f32 %v2027_v28, 0.0  ;;  %5304 = vmatpush3.msra.mxu1 %v6467_v35 }
 0xbdc   :  { %5305 = vmatprep.subr.mxu1 %v6544_v52 }
 0xbdd   :  { %5278 = vmatprep.mubr.msk.f32.mxu1 %vm89_vm0, %v2037_v29  ;;  %5306 = vmatpush3.msra.mxu1 %v6544_v52 }
 0xbde   :  { %5279 = vmatmul.mubr.msk.f32.gmra.mxu1 %vm89_vm0, %v2038_v51  ;;  %5335 = vmatprep.subr.mxu1 %v6553_v34 }
 0xbdf   :  { %5307 = vmatprep.mubr.msk.f32.mxu1 %vm187_vm1, %v4361_v14  ;;  %v6706_v14 = vld [vmem:[%s7169_s3 + $0xf0] sm:$0xff] }
 0xbe2   :  { %5308 = vmatmul.mubr.msk.f32.vlgmr.msra.gmra.mxu1 %vm187_vm1, %v4362_v53  ;;  %v6715_v53 = vld [vmem:[%s7169_s3 + $0xe8] sm:$0xff] }
 0xbe3   :  { %5336 = vmatpush3.msra.mxu1 %v6553_v34  ;;  %5310 = vmatprep.mubr.msk.f32.mxu1 %vm187_vm1, %v4363_v54  ;;  %v6722_v54 = vld [vmem:[%s7169_s3 + $0xe0] sm:$0xff] }
 0xbe4   :  { %5337 = vmatprep.subr.mxu1 %v6571_v15 }
 0xbe5   :  { %5338 = vmatpush3.msra.mxu1 %v6571_v15 }
 0xbe6   :  { %5311 = vmatmul.mubr.msk.f32.gmra.mxu1 %vm187_vm1, %v4364_v16  ;;  %5339 = vmatprep.subr.mxu1 %v6583_v17  ;;  %v6729_v16 = vld [vmem:[%s7169_s3 + $0xd8] sm:$0xff] }
 0xbe7   :  { %5340 = vmatpush3.msra.mxu1 %v6583_v17 }
 0xbe8   :  { %5341 = vmatprep.subr.mxu1 %v6590_v36 }
 0xbe9   :  { %5342 = vmatpush3.msra.mxu1 %v6590_v36 }
 0xbea   :  { %5343 = vmatprep.subr.mxu1 %v6597_v18 }
 0xbeb   :  { %5344 = vmatpush3.msra.mxu1 %v6597_v18 }
 0xbec   :  { %5345 = vmatprep.subr.mxu1 %v6604_v19 }
 0xbed   :  { %5346 = vmatpush3.msra.mxu1 %v6604_v19 }
 0xbee   :  { %5347 = vmatprep.subr.mxu1 %v6611_v20 }
 0xbef   :  { %5348 = vmatpush3.msra.mxu1 %v6611_v20 }
 0xbf0   :  { %5349 = vmatprep.subr.mxu1 %v6618_v21 }
 0xbf1   :  { %5350 = vmatpush3.msra.mxu1 %v6618_v21 }
 0xbf2   :  { %5379 = vmatprep.subr.mxu1 %v6410_v26 }
 0xc9a   :  { %v5277_v37 = vpop.f32.mrf.mxu1 }
 0xc9b   :  { %v2123_v22 = vadd.f32 %v5277_v37, %v6166_v61  ;;  %v6736_v37 = vld [vmem:[%s7169_s3 + $0xd0] sm:$0xff] }
 0xc9c   :  { %v2117_v38 = vpop.f32.mrf.mxu1 }
 0xc9d   :  { %v2137_v39 = vmax.f32 %v2123_v22, 0.0  ;;  %v2118_v23 = vadd.f32 %v6166_v61, %v2117_v38  ;;  %v6743_v22 = vld [vmem:[%s7169_s3 + $0xc8] sm:$0xff]  ;;  %v6750_v38 = vld [vmem:[%s7169_s3 + $0xc0] sm:$0xff] }
 0xc9e   :  { %v5280_v40 = vpop.f32.mrf.mxu1 }
 0xc9f   :  { %2142 = vst.msk [vmem:[#allocation2 + $0x68] sm:$0xff] %vm89_vm0, %v2137_v39  ;;  %v2136_v41 = vmax.f32 %v2118_v23, 0.0  ;;  %v2133_v24 = vadd.f32 %v5280_v40, %v6166_v61  ;;  %v6758_v23 = vld [vmem:[%s7170_s4 + $0x1] ss:$0 sm:$0xff] }
 0xca0   :  { %v2127_v42 = vpop.f32.mrf.mxu1 }
 0xca1   :  { %2141 = vst.msk [vmem:[#allocation2 + $0x60] sm:$0xff] %vm89_vm0, %v2136_v41  ;;  %v2139_v43 = vmax.f32 %v2133_v24, 0.0  ;;  %v2128_v44 = vadd.f32 %v6166_v61, %v2127_v42  ;;  %5297 = vmatprep.mubr.msk.f32.mxu0 %vm89_vm0, %v2136_v41  ;;  %v6646_v61 = vld [vmem:[%s7169_s3 + $0x68] sm:$0xff] }
 0xca2   :  { %5298 = vmatmul.mubr.msk.f32.vlgmr.msra.gmra.mxu0 %vm89_vm0, %v2137_v39  ;;  %v5309_v58 = vpop.f32.mrf.mxu1 }
 0xca3   :  { %2144 = vst.msk [vmem:[#allocation2 + $0x78] sm:$0xff] %vm89_vm0, %v2139_v43  ;;  %v2138_v25 = vmax.f32 %v2128_v44, 0.0  ;;  %5314 = vmatpush3.msra.mxu0 %v6531_v6 }
 0xca4   :  { %5315 = vmatprep.subr.mxu0 %v6636_v45  ;;  %v2325_v30 = vpop.f32.mrf.mxu1 }
 0xca5   :  { %2143 = vst.msk [vmem:[#allocation2 + $0x70] sm:$0xff] %vm89_vm0, %v2138_v25  ;;  %5300 = vmatprep.mubr.msk.f32.mxu0 %vm89_vm0, %v2138_v25  ;;  %5316 = vmatpush3.msra.mxu0 %v6636_v45 }
 0xca6   :  { %5301 = vmatmul.mubr.msk.f32.gmra.mxu0 %vm89_vm0, %v2139_v43  ;;  %5317 = vmatprep.subr.mxu0 %v6646_v61  ;;  %v5312_v50 = vpop.f32.mrf.mxu1 }
 0xca7   :  { %5318 = vmatpush3.msra.mxu0 %v6646_v61 }
 0xca8   :  { %5319 = vmatprep.subr.mxu0 %v6653_v46  ;;  %v2335_v9 = vpop.f32.mrf.mxu1 }
 0xca9   :  { %5320 = vmatpush3.msra.mxu0 %v6653_v46 }
 0xcaa   :  { %5321 = vmatprep.subr.mxu0 %v6660_v47 }
 0xcab   :  { %5322 = vmatpush3.msra.mxu0 %v6660_v47 }
 0xcac   :  { %5323 = vmatprep.subr.mxu0 %v6667_v48 }
 0xcad   :  { %5324 = vmatpush3.msra.mxu0 %v6667_v48 }
 0xcae   :  { %5325 = vmatprep.subr.mxu0 %v6674_v55 }
 0xcaf   :  { %5326 = vmatpush3.msra.mxu0 %v6674_v55 }
 0xcb0   :  { %5327 = vmatprep.subr.mxu0 %v6681_v56 }
 0xcb1   :  { %5328 = vmatpush3.msra.mxu0 %v6681_v56 }
 0xcb2   :  { %5357 = vmatprep.subr.mxu0 %v6688_v57 }
 0xd62   :  { %v5299_v31 = vpop.f32.mrf.mxu0 }
 0xd63   :  { %v2331_v32 = vadd.f32 %v5309_v58, %v5299_v31 }
 0xd64   :  { %v2228_v49 = vpop.f32.mrf.mxu0 }
 0xd65   :  { %v2326_v33 = vadd.f32 %v2325_v30, %v2228_v49  ;;  %v2345_v0 = vadd.f32 %v6694_v60, %v2331_v32 }
 0xd66   :  { %v5302_v3 = vpop.f32.mrf.mxu0 }
 0xd67   :  { %v2344_v7 = vadd.f32 %v6694_v60, %v2326_v33  ;;  %v2341_v8 = vadd.f32 %v5312_v50, %v5302_v3  ;;  %v2349_v13 = vmax.f32 %v2345_v0, 0.0  ;;  %v6787_v50 = vld [vmem:[%s7170_s4 + $0x2] ss:$0 sm:$0xff] }
 0xd68   :  { %v2238_v11 = vpop.f32.mrf.mxu0 }
 0xd69   :  { %v2348_v10 = vmax.f32 %v2344_v7, 0.0  ;;  %v2336_v12 = vadd.f32 %v2335_v9, %v2238_v11  ;;  %v2347_v27 = vadd.f32 %v6694_v60, %v2341_v8 }
 0xd6b   :  { %v2346_v28 = vadd.f32 %v6694_v60, %v2336_v12  ;;  %5329 = vmatprep.mubr.msk.f32.mxu0 %vm89_vm0, %v2348_v10  ;;  %v2351_v51 = vmax.f32 %v2347_v27, 0.0 }
 0xd6c   :  { %5330 = vmatmul.mubr.msk.f32.vlgmr.msra.gmra.mxu0 %vm89_vm0, %v2349_v13 }
 0xd6d   :  { %v2350_v29 = vmax.f32 %v2346_v28, 0.0  ;;  %5358 = vmatpush3.msra.mxu0 %v6688_v57  ;;  %v4385_v28 = vld [vmem:[%s7166_s0 + $0xa0] sm:$0xff] }
 0xd6e   :  { %5359 = vmatprep.subr.mxu0 %v6706_v14 }
 0xd6f   :  { %5332 = vmatprep.mubr.msk.f32.mxu0 %vm89_vm0, %v2350_v29  ;;  %5360 = vmatpush3.msra.mxu0 %v6706_v14  ;;  %v4386_v29 = vld [vmem:[%s7166_s0 + $0xa8] sm:$0xff] }
 0xd70   :  { %5333 = vmatmul.mubr.msk.f32.gmra.mxu0 %vm89_vm0, %v2351_v51  ;;  %5361 = vmatprep.subr.mxu0 %v6715_v53  ;;  %v4387_v51 = vld [vmem:[%s7166_s0 + $0xb0] sm:$0xff] }
 0xd71   :  { %5362 = vmatpush3.msra.mxu0 %v6715_v53 }
 0xd72   :  { %5363 = vmatprep.subr.mxu0 %v6722_v54 }
 0xd73   :  { %5364 = vmatpush3.msra.mxu0 %v6722_v54 }
 0xd74   :  { %5365 = vmatprep.subr.mxu0 %v6729_v16 }
 0xd75   :  { %5366 = vmatpush3.msra.mxu0 %v6729_v16 }
 0xd76   :  { %5367 = vmatprep.subr.mxu0 %v6736_v37 }
 0xd77   :  { %5368 = vmatpush3.msra.mxu0 %v6736_v37 }
 0xd78   :  { %5369 = vmatprep.subr.mxu0 %v6743_v22 }
 0xd79   :  { %5370 = vmatpush3.msra.mxu0 %v6743_v22 }
 0xd7a   :  { %5371 = vmatprep.subr.mxu0 %v6750_v38 }
 0xd7b   :  { %5372 = vmatpush3.msra.mxu0 %v6750_v38 }
 0xd7c   :  { %5401 = vmatprep.subr.mxu0 %v6467_v35 }
 0xe2c   :  { %v5331_v39 = vpop.f32.mrf.mxu0 }
 0xe2d   :  { %v2436_v40 = vadd.f32 %v6758_v23, %v5331_v39  ;;  %v4388_v39 = vld [vmem:[%s7166_s0 + $0xb8] sm:$0xff] }
 0xe2e   :  { %v2430_v41 = vpop.f32.mrf.mxu0 }
 0xe2f   :  { %v2431_v24 = vadd.f32 %v6758_v23, %v2430_v41  ;;  %v2450_v44 = vmax.f32 %v2436_v40, 0.0  ;;  %v6836_v41 = vld [vmem:[%s7170_s4 + $0x3] ss:$0 sm:$0xff] }
 0xe30   :  { %v5334_v42 = vpop.f32.mrf.mxu0 }
 0xe31   :  { %v2449_v43 = vmax.f32 %v2431_v24, 0.0  ;;  %v2446_v25 = vadd.f32 %v6758_v23, %v5334_v42 }
 0xe32   :  { %v2440_v58 = vpop.f32.mrf.mxu0 }
 0xe33   :  { %v2441_v30 = vadd.f32 %v6758_v23, %v2440_v58  ;;  %5351 = vmatprep.mubr.msk.f32.mxu1 %vm89_vm0, %v2449_v43  ;;  %v2452_v32 = vmax.f32 %v2446_v25, 0.0 }
 0xe34   :  { %5352 = vmatmul.mubr.msk.f32.vlgmr.msra.gmra.mxu1 %vm89_vm0, %v2450_v44 }
 0xe35   :  { %v2451_v31 = vmax.f32 %v2441_v30, 0.0  ;;  %5380 = vmatpush3.msra.mxu1 %v6410_v26 }
 0xe36   :  { %5381 = vmatprep.subr.mxu1 %v6480_v1 }
 0xe37   :  { %5354 = vmatprep.mubr.msk.f32.mxu1 %vm89_vm0, %v2451_v31  ;;  %5382 = vmatpush3.msra.mxu1 %v6480_v1 }
 0xe38   :  { %5355 = vmatmul.mubr.msk.f32.gmra.mxu1 %vm89_vm0, %v2452_v32  ;;  %5383 = vmatprep.subr.mxu1 %v6489_v59 }
 0xe39   :  { %5384 = vmatpush3.msra.mxu1 %v6489_v59 }
 0xe3a   :  { %5385 = vmatprep.subr.mxu1 %v6496_v2 }
 0xe3b   :  { %5386 = vmatpush3.msra.mxu1 %v6496_v2 }
 0xe3c   :  { %5387 = vmatprep.subr.mxu1 %v6503_v4 }
 0xe3d   :  { %5388 = vmatpush3.msra.mxu1 %v6503_v4 }
 0xe3e   :  { %5389 = vmatprep.subr.mxu1 %v6510_v5 }
 0xe3f   :  { %5390 = vmatpush3.msra.mxu1 %v6510_v5 }
 0xe40   :  { %5391 = vmatprep.subr.mxu1 %v6517_v62 }
 0xe41   :  { %5392 = vmatpush3.msra.mxu1 %v6517_v62 }
 0xe42   :  { %5393 = vmatprep.subr.mxu1 %v6524_v63 }
 0xe43   :  { %5394 = vmatpush3.msra.mxu1 %v6524_v63 }
 0xe44   :  { %5411 = vmatprep.subr.mxu1 %v6531_v6 }
 0xef4   :  { %v5353_v49 = vpop.f32.mrf.mxu1 }
 0xef5   :  { %v2537_v33 = vadd.f32 %v6787_v50, %v5353_v49 }
 0xef6   :  { %v2531_v0 = vpop.f32.mrf.mxu1 }
 0xef7   :  { %v2532_v3 = vadd.f32 %v6787_v50, %v2531_v0  ;;  %v2551_v9 = vmax.f32 %v2537_v33, 0.0 }
 0xef8   :  { %v5356_v7 = vpop.f32.mrf.mxu1 }
 0xef9   :  { %v2550_v8 = vmax.f32 %v2532_v3, 0.0  ;;  %v2547_v11 = vadd.f32 %v6787_v50, %v5356_v7 }
 0xefa   :  { %v2541_v10 = vpop.f32.mrf.mxu1 }
 0xefb   :  { %v2542_v12 = vadd.f32 %v6787_v50, %v2541_v10  ;;  %5373 = vmatprep.mubr.msk.f32.mxu0 %vm89_vm0, %v2550_v8  ;;  %v2553_v27 = vmax.f32 %v2547_v11, 0.0 }
 0xefc   :  { %5374 = vmatmul.mubr.msk.f32.vlgmr.msra.gmra.mxu0 %vm89_vm0, %v2551_v9 }
 0xefd   :  { %v2552_v13 = vmax.f32 %v2542_v12, 0.0  ;;  %5402 = vmatpush3.msra.mxu0 %v6467_v35 }
 0xefe   :  { %5403 = vmatprep.subr.mxu0 %v6544_v52 }
 0xeff   :  { %5376 = vmatprep.mubr.msk.f32.mxu0 %vm89_vm0, %v2552_v13  ;;  %5404 = vmatpush3.msra.mxu0 %v6544_v52 }
 0xf00   :  { %5377 = vmatmul.mubr.msk.f32.gmra.mxu0 %vm89_vm0, %v2553_v27  ;;  %5433 = vmatprep.subr.mxu0 %v6553_v34 }
 0xf01   :  { %5405 = vmatprep.mubr.msk.f32.mxu0 %vm187_vm1, %v4385_v28 }
 0xf04   :  { %5406 = vmatmul.mubr.msk.f32.vlgmr.msra.gmra.mxu0 %vm187_vm1, %v4386_v29 }
 0xf05   :  { %5434 = vmatpush3.msra.mxu0 %v6553_v34  ;;  %5408 = vmatprep.mubr.msk.f32.mxu0 %vm187_vm1, %v4387_v51 }
 0xf06   :  { %5435 = vmatprep.subr.mxu0 %v6571_v15 }
 0xf07   :  { %5436 = vmatpush3.msra.mxu0 %v6571_v15 }
 0xf08   :  { %5409 = vmatmul.mubr.msk.f32.gmra.mxu0 %vm187_vm1, %v4388_v39  ;;  %5437 = vmatprep.subr.mxu0 %v6583_v17 }
 0xf09   :  { %5438 = vmatpush3.msra.mxu0 %v6583_v17 }
 0xf0a   :  { %5439 = vmatprep.subr.mxu0 %v6590_v36 }
 0xf0b   :  { %5440 = vmatpush3.msra.mxu0 %v6590_v36 }
 0xf0c   :  { %5441 = vmatprep.subr.mxu0 %v6597_v18 }
 0xf0d   :  { %5442 = vmatpush3.msra.mxu0 %v6597_v18 }
 0xf0e   :  { %5443 = vmatprep.subr.mxu0 %v6604_v19 }
 0xf0f   :  { %5444 = vmatpush3.msra.mxu0 %v6604_v19 }
 0xf10   :  { %5445 = vmatprep.subr.mxu0 %v6611_v20 }
 0xf11   :  { %5446 = vmatpush3.msra.mxu0 %v6611_v20 }
 0xf12   :  { %5447 = vmatprep.subr.mxu0 %v6618_v21 }
 0xf13   :  { %5448 = vmatpush3.msra.mxu0 %v6618_v21 }
 0xf14   :  { %5477 = vmatprep.subr.mxu0 %v6410_v26 }
 0xfbc   :  { %v5375_v40 = vpop.f32.mrf.mxu0 }
 0xfbd   :  { %v2638_v24 = vadd.f32 %v6836_v41, %v5375_v40 }
 0xfbe   :  { %v2632_v42 = vpop.f32.mrf.mxu0 }
 0xfbf   :  { %v2652_v43 = vmax.f32 %v2638_v24, 0.0  ;;  %v2633_v44 = vadd.f32 %v6836_v41, %v2632_v42 }
 0xfc0   :  { %v5378_v25 = vpop.f32.mrf.mxu0 }
 0xfc1   :  { %2657 = vst.msk [vmem:[#allocation2 + $0x88] sm:$0xff] %vm89_vm0, %v2652_v43  ;;  %v2651_v58 = vmax.f32 %v2633_v44, 0.0  ;;  %v2648_v30 = vadd.f32 %v6836_v41, %v5378_v25 }
 0xfc2   :  { %v2642_v31 = vpop.f32.mrf.mxu0 }
 0xfc3   :  { %2656 = vst.msk [vmem:[#allocation2 + $0x80] sm:$0xff] %vm89_vm0, %v2651_v58  ;;  %v2654_v32 = vmax.f32 %v2648_v30, 0.0  ;;  %v2643_v49 = vadd.f32 %v6836_v41, %v2642_v31  ;;  %5395 = vmatprep.mubr.msk.f32.mxu1 %vm89_vm0, %v2651_v58 }
 0xfc4   :  { %5396 = vmatmul.mubr.msk.f32.vlgmr.msra.gmra.mxu1 %vm89_vm0, %v2652_v43  ;;  %v5407_v0 = vpop.f32.mrf.mxu0 }
 0xfc5   :  { %2659 = vst.msk [vmem:[#allocation2 + $0x98] sm:$0xff] %vm89_vm0, %v2654_v32  ;;  %v2653_v33 = vmax.f32 %v2643_v49, 0.0  ;;  %5412 = vmatpush3.msra.mxu1 %v6531_v6 }
 0xfc6   :  { %5413 = vmatprep.subr.mxu1 %v6636_v45  ;;  %v2840_v3 = vpop.f32.mrf.mxu0 }
 0xfc7   :  { %2658 = vst.msk [vmem:[#allocation2 + $0x90] sm:$0xff] %vm89_vm0, %v2653_v33  ;;  %5398 = vmatprep.mubr.msk.f32.mxu1 %vm89_vm0, %v2653_v33  ;;  %5414 = vmatpush3.msra.mxu1 %v6636_v45 }
 0xfc8   :  { %5399 = vmatmul.mubr.msk.f32.gmra.mxu1 %vm89_vm0, %v2654_v32  ;;  %5415 = vmatprep.subr.mxu1 %v6646_v61  ;;  %v5410_v11 = vpop.f32.mrf.mxu0 }
 0xfc9   :  { %5416 = vmatpush3.msra.mxu1 %v6646_v61 }
 0xfca   :  { %5417 = vmatprep.subr.mxu1 %v6653_v46  ;;  %v2850_v29 = vpop.f32.mrf.mxu0 }
 0xfcb   :  { %5418 = vmatpush3.msra.mxu1 %v6653_v46 }
 0xfcc   :  { %5419 = vmatprep.subr.mxu1 %v6660_v47 }
 0xfcd   :  { %5420 = vmatpush3.msra.mxu1 %v6660_v47 }
 0xfce   :  { %5421 = vmatprep.subr.mxu1 %v6667_v48 }
 0xfcf   :  { %5422 = vmatpush3.msra.mxu1 %v6667_v48 }
 0xfd0   :  { %5423 = vmatprep.subr.mxu1 %v6674_v55 }
 0xfd1   :  { %5424 = vmatpush3.msra.mxu1 %v6674_v55 }
 0xfd2   :  { %5425 = vmatprep.subr.mxu1 %v6681_v56 }
 0xfd3   :  { %5426 = vmatpush3.msra.mxu1 %v6681_v56 }
 0xfd4   :  { %5455 = vmatprep.subr.mxu1 %v6688_v57 }
0x1084   :  { %v5397_v7 = vpop.f32.mrf.mxu1 }
0x1085   :  { %v2846_v8 = vadd.f32 %v5407_v0, %v5397_v7 }
0x1086   :  { %v2743_v9 = vpop.f32.mrf.mxu1 }
0x1087   :  { %v2841_v10 = vadd.f32 %v2840_v3, %v2743_v9  ;;  %v2860_v12 = vadd.f32 %v6694_v60, %v2846_v8 }
0x1088   :  { %v5400_v13 = vpop.f32.mrf.mxu1 }
0x1089   :  { %v2859_v27 = vadd.f32 %v6694_v60, %v2841_v10  ;;  %v2856_v28 = vadd.f32 %v5410_v11, %v5400_v13  ;;  %v2864_v24 = vmax.f32 %v2860_v12, 0.0 }
0x108a   :  { %v2753_v51 = vpop.f32.mrf.mxu1 }
0x108b   :  { %v2863_v39 = vmax.f32 %v2859_v27, 0.0  ;;  %v2851_v40 = vadd.f32 %v2850_v29, %v2753_v51  ;;  %v2862_v42 = vadd.f32 %v6694_v60, %v2856_v28 }
0x108d   :  { %v2861_v43 = vadd.f32 %v6694_v60, %v2851_v40  ;;  %5427 = vmatprep.mubr.msk.f32.mxu1 %vm89_vm0, %v2863_v39  ;;  %v2866_v25 = vmax.f32 %v2862_v42, 0.0 }
0x108e   :  { %5428 = vmatmul.mubr.msk.f32.vlgmr.msra.gmra.mxu1 %vm89_vm0, %v2864_v24 }
0x108f   :  { %v2865_v44 = vmax.f32 %v2861_v43, 0.0  ;;  %5456 = vmatpush3.msra.mxu1 %v6688_v57 }
0x1090   :  { %5457 = vmatprep.subr.mxu1 %v6706_v14 }
0x1091   :  { %5430 = vmatprep.mubr.msk.f32.mxu1 %vm89_vm0, %v2865_v44  ;;  %5458 = vmatpush3.msra.mxu1 %v6706_v14  ;;  %v4409_v44 = vld [vmem:[%s7166_s0 + $0xc0] sm:$0xff] }
0x1092   :  { %5431 = vmatmul.mubr.msk.f32.gmra.mxu1 %vm89_vm0, %v2866_v25  ;;  %5459 = vmatprep.subr.mxu1 %v6715_v53  ;;  %v4410_v25 = vld [vmem:[%s7166_s0 + $0xc8] sm:$0xff] }
0x1093   :  { %5460 = vmatpush3.msra.mxu1 %v6715_v53 }
0x1094   :  { %5461 = vmatprep.subr.mxu1 %v6722_v54 }
0x1095   :  { %5462 = vmatpush3.msra.mxu1 %v6722_v54 }
0x1096   :  { %5463 = vmatprep.subr.mxu1 %v6729_v16 }
0x1097   :  { %5464 = vmatpush3.msra.mxu1 %v6729_v16 }
0x1098   :  { %5465 = vmatprep.subr.mxu1 %v6736_v37 }
0x1099   :  { %5466 = vmatpush3.msra.mxu1 %v6736_v37 }
0x109a   :  { %5467 = vmatprep.subr.mxu1 %v6743_v22 }
0x109b   :  { %5468 = vmatpush3.msra.mxu1 %v6743_v22 }
0x109c   :  { %5469 = vmatprep.subr.mxu1 %v6750_v38 }
0x109d   :  { %5470 = vmatpush3.msra.mxu1 %v6750_v38 }
0x109e   :  { %5499 = vmatprep.subr.mxu1 %v6467_v35 }
0x114e   :  { %v5429_v58 = vpop.f32.mrf.mxu1 }
0x114f   :  { %v2951_v30 = vadd.f32 %v6758_v23, %v5429_v58  ;;  %v4411_v58 = vld [vmem:[%s7166_s0 + $0xd0] sm:$0xff] }
0x1150   :  { %v2945_v31 = vpop.f32.mrf.mxu1 }
0x1151   :  { %v2946_v32 = vadd.f32 %v6758_v23, %v2945_v31  ;;  %v2965_v0 = vmax.f32 %v2951_v30, 0.0  ;;  %v4412_v30 = vld [vmem:[%s7166_s0 + $0xd8] sm:$0xff] }
0x1152   :  { %v5432_v49 = vpop.f32.mrf.mxu1 }
0x1153   :  { %v2964_v33 = vmax.f32 %v2946_v32, 0.0  ;;  %v2961_v3 = vadd.f32 %v6758_v23, %v5432_v49 }
0x1154   :  { %v2955_v7 = vpop.f32.mrf.mxu1 }
0x1155   :  { %v2956_v8 = vadd.f32 %v6758_v23, %v2955_v7  ;;  %5449 = vmatprep.mubr.msk.f32.mxu0 %vm89_vm0, %v2964_v33  ;;  %v2967_v11 = vmax.f32 %v2961_v3, 0.0 }
0x1156   :  { %5450 = vmatmul.mubr.msk.f32.vlgmr.msra.gmra.mxu0 %vm89_vm0, %v2965_v0 }
0x1157   :  { %v2966_v9 = vmax.f32 %v2956_v8, 0.0  ;;  %5478 = vmatpush3.msra.mxu0 %v6410_v26 }
0x1158   :  { %5479 = vmatprep.subr.mxu0 %v6480_v1 }
0x1159   :  { %5452 = vmatprep.mubr.msk.f32.mxu0 %vm89_vm0, %v2966_v9  ;;  %5480 = vmatpush3.msra.mxu0 %v6480_v1 }
0x115a   :  { %5453 = vmatmul.mubr.msk.f32.gmra.mxu0 %vm89_vm0, %v2967_v11  ;;  %5481 = vmatprep.subr.mxu0 %v6489_v59 }
0x115b   :  { %5482 = vmatpush3.msra.mxu0 %v6489_v59 }
0x115c   :  { %5483 = vmatprep.subr.mxu0 %v6496_v2 }
0x115d   :  { %5484 = vmatpush3.msra.mxu0 %v6496_v2 }
0x115e   :  { %5485 = vmatprep.subr.mxu0 %v6503_v4 }
0x115f   :  { %5486 = vmatpush3.msra.mxu0 %v6503_v4 }
0x1160   :  { %5487 = vmatprep.subr.mxu0 %v6510_v5 }
0x1161   :  { %5488 = vmatpush3.msra.mxu0 %v6510_v5 }
0x1162   :  { %5489 = vmatprep.subr.mxu0 %v6517_v62 }
0x1163   :  { %5490 = vmatpush3.msra.mxu0 %v6517_v62 }
0x1164   :  { %5491 = vmatprep.subr.mxu0 %v6524_v63 }
0x1165   :  { %5492 = vmatpush3.msra.mxu0 %v6524_v63 }
0x1166   :  { %5509 = vmatprep.subr.mxu0 %v6531_v6 }
0x1216   :  { %v5451_v10 = vpop.f32.mrf.mxu0 }
0x1217   :  { %v3052_v12 = vadd.f32 %v6787_v50, %v5451_v10 }
0x1218   :  { %v3046_v13 = vpop.f32.mrf.mxu0 }
0x1219   :  { %v3047_v27 = vadd.f32 %v6787_v50, %v3046_v13  ;;  %v3066_v51 = vmax.f32 %v3052_v12, 0.0 }
0x121a   :  { %v5454_v28 = vpop.f32.mrf.mxu0 }
0x121b   :  { %v3065_v29 = vmax.f32 %v3047_v27, 0.0  ;;  %v3062_v39 = vadd.f32 %v6787_v50, %v5454_v28 }
0x121c   :  { %v3056_v40 = vpop.f32.mrf.mxu0 }
0x121d   :  { %v3057_v24 = vadd.f32 %v6787_v50, %v3056_v40  ;;  %5471 = vmatprep.mubr.msk.f32.mxu1 %vm89_vm0, %v3065_v29  ;;  %v3068_v43 = vmax.f32 %v3062_v39, 0.0 }
0x121e   :  { %5472 = vmatmul.mubr.msk.f32.vlgmr.msra.gmra.mxu1 %vm89_vm0, %v3066_v51 }
0x121f   :  { %v3067_v42 = vmax.f32 %v3057_v24, 0.0  ;;  %5500 = vmatpush3.msra.mxu1 %v6467_v35 }
0x1220   :  { %5501 = vmatprep.subr.mxu1 %v6544_v52 }
0x1221   :  { %5474 = vmatprep.mubr.msk.f32.mxu1 %vm89_vm0, %v3067_v42  ;;  %5502 = vmatpush3.msra.mxu1 %v6544_v52 }
0x1222   :  { %5475 = vmatmul.mubr.msk.f32.gmra.mxu1 %vm89_vm0, %v3068_v43  ;;  %5531 = vmatprep.subr.mxu1 %v6553_v34 }
0x1223   :  { %5503 = vmatprep.mubr.msk.f32.mxu1 %vm187_vm1, %v4409_v44 }
0x1226   :  { %5504 = vmatmul.mubr.msk.f32.vlgmr.msra.gmra.mxu1 %vm187_vm1, %v4410_v25 }
0x1227   :  { %5532 = vmatpush3.msra.mxu1 %v6553_v34  ;;  %5506 = vmatprep.mubr.msk.f32.mxu1 %vm187_vm1, %v4411_v58 }
0x1228   :  { %5533 = vmatprep.subr.mxu1 %v6571_v15 }
0x1229   :  { %5534 = vmatpush3.msra.mxu1 %v6571_v15 }
0x122a   :  { %5507 = vmatmul.mubr.msk.f32.gmra.mxu1 %vm187_vm1, %v4412_v30  ;;  %5535 = vmatprep.subr.mxu1 %v6583_v17 }
0x122b   :  { %5536 = vmatpush3.msra.mxu1 %v6583_v17 }
0x122c   :  { %5537 = vmatprep.subr.mxu1 %v6590_v36 }
0x122d   :  { %5538 = vmatpush3.msra.mxu1 %v6590_v36 }
0x122e   :  { %5539 = vmatprep.subr.mxu1 %v6597_v18 }
0x122f   :  { %5540 = vmatpush3.msra.mxu1 %v6597_v18 }
0x1230   :  { %5541 = vmatprep.subr.mxu1 %v6604_v19 }
0x1231   :  { %5542 = vmatpush3.msra.mxu1 %v6604_v19 }
0x1232   :  { %5543 = vmatprep.subr.mxu1 %v6611_v20 }
0x1233   :  { %5544 = vmatpush3.msra.mxu1 %v6611_v20 }
0x1234   :  { %5545 = vmatprep.subr.mxu1 %v6618_v21 }
0x1235   :  { %5546 = vmatpush3.msra.mxu1 %v6618_v21 }
0x1236   :  { %5575 = vmatprep.subr.mxu1 %v6410_v26 }
0x12de   :  { %v5473_v31 = vpop.f32.mrf.mxu1 }
0x12df   :  { %v3153_v32 = vadd.f32 %v6836_v41, %v5473_v31 }
0x12e0   :  { %v3147_v49 = vpop.f32.mrf.mxu1 }
0x12e1   :  { %v3167_v33 = vmax.f32 %v3153_v32, 0.0  ;;  %v3148_v0 = vadd.f32 %v6836_v41, %v3147_v49 }
0x12e2   :  { %v5476_v3 = vpop.f32.mrf.mxu1 }
0x12e3   :  { %3172 = vst.msk [vmem:[#allocation2 + $0xa8] sm:$0xff] %vm89_vm0, %v3167_v33  ;;  %v3166_v7 = vmax.f32 %v3148_v0, 0.0  ;;  %v3163_v8 = vadd.f32 %v6836_v41, %v5476_v3 }
0x12e4   :  { %v3157_v9 = vpop.f32.mrf.mxu1 }
0x12e5   :  { %3171 = vst.msk [vmem:[#allocation2 + $0xa0] sm:$0xff] %vm89_vm0, %v3166_v7  ;;  %v3169_v11 = vmax.f32 %v3163_v8, 0.0  ;;  %v3158_v10 = vadd.f32 %v6836_v41, %v3157_v9  ;;  %5493 = vmatprep.mubr.msk.f32.mxu0 %vm89_vm0, %v3166_v7 }
0x12e6   :  { %5494 = vmatmul.mubr.msk.f32.vlgmr.msra.gmra.mxu0 %vm89_vm0, %v3167_v33  ;;  %v5505_v12 = vpop.f32.mrf.mxu1 }
0x12e7   :  { %3174 = vst.msk [vmem:[#allocation2 + $0xb8] sm:$0xff] %vm89_vm0, %v3169_v11  ;;  %v3168_v26 = vmax.f32 %v3158_v10, 0.0  ;;  %5510 = vmatpush3.msra.mxu0 %v6531_v6 }
0x12e8   :  { %5511 = vmatprep.subr.mxu0 %v6636_v45  ;;  %v3355_v13 = vpop.f32.mrf.mxu1 }
0x12e9   :  { %3173 = vst.msk [vmem:[#allocation2 + $0xb0] sm:$0xff] %vm89_vm0, %v3168_v26  ;;  %5496 = vmatprep.mubr.msk.f32.mxu0 %vm89_vm0, %v3168_v26  ;;  %5512 = vmatpush3.msra.mxu0 %v6636_v45 }
0x12ea   :  { %5497 = vmatmul.mubr.msk.f32.gmra.mxu0 %vm89_vm0, %v3169_v11  ;;  %5513 = vmatprep.subr.mxu0 %v6646_v61  ;;  %v5508_v51 = vpop.f32.mrf.mxu1 }
0x12eb   :  { %5514 = vmatpush3.msra.mxu0 %v6646_v61 }
0x12ec   :  { %5515 = vmatprep.subr.mxu0 %v6653_v46  ;;  %v3365_v44 = vpop.f32.mrf.mxu1 }
0x12ed   :  { %5516 = vmatpush3.msra.mxu0 %v6653_v46 }
0x12ee   :  { %5517 = vmatprep.subr.mxu0 %v6660_v47 }
0x12ef   :  { %5518 = vmatpush3.msra.mxu0 %v6660_v47 }
0x12f0   :  { %5519 = vmatprep.subr.mxu0 %v6667_v48 }
0x12f1   :  { %5520 = vmatpush3.msra.mxu0 %v6667_v48 }
0x12f2   :  { %5521 = vmatprep.subr.mxu0 %v6674_v55 }
0x12f3   :  { %5522 = vmatpush3.msra.mxu0 %v6674_v55 }
0x12f4   :  { %5523 = vmatprep.subr.mxu0 %v6681_v56 }
0x12f5   :  { %5524 = vmatpush3.msra.mxu0 %v6681_v56 }
0x12f6   :  { %5553 = vmatprep.subr.mxu0 %v6688_v57 }
0x13a6   :  { %v5495_v27 = vpop.f32.mrf.mxu0 }
0x13a7   :  { %v3361_v28 = vadd.f32 %v5505_v12, %v5495_v27 }
0x13a8   :  { %v3258_v29 = vpop.f32.mrf.mxu0 }
0x13a9   :  { %v3356_v39 = vadd.f32 %v3355_v13, %v3258_v29  ;;  %v3375_v40 = vadd.f32 %v6694_v60, %v3361_v28  ;;  %v5715_v29 = vld [vmem:[%s7169_s3 + $0x38] sm:$0xff] }
0x13aa   :  { %v5498_v24 = vpop.f32.mrf.mxu0 }
0x13ab   :  { %v3374_v42 = vadd.f32 %v6694_v60, %v3356_v39  ;;  %v3371_v43 = vadd.f32 %v5508_v51, %v5498_v24  ;;  %v3379_v31 = vmax.f32 %v3375_v40, 0.0 }
0x13ac   :  { %v3268_v25 = vpop.f32.mrf.mxu0 }
0x13ad   :  { %v3378_v58 = vmax.f32 %v3374_v42, 0.0  ;;  %v3366_v30 = vadd.f32 %v3365_v44, %v3268_v25  ;;  %v3377_v32 = vadd.f32 %v6694_v60, %v3371_v43  ;;  %v4433_v43 = vld [vmem:[%s7166_s0 + $0xe0] sm:$0xff]  ;;  %v4436_v44 = vld [vmem:[%s7166_s0 + $0xf8] sm:$0xff] }
0x13af   :  { %v3376_v49 = vadd.f32 %v6694_v60, %v3366_v30  ;;  %5525 = vmatprep.mubr.msk.f32.mxu0 %vm89_vm0, %v3378_v58  ;;  %v3381_v0 = vmax.f32 %v3377_v32, 0.0  ;;  %v5716_v32 = vld [vmem:[%s7169_s3 + $0x78] sm:$0xff]  ;;  %s5761_s3 = smov [#allocation2]  }
0x13b0   :  { %5526 = vmatmul.mubr.msk.f32.vlgmr.msra.gmra.mxu0 %vm89_vm0, %v3379_v31  ;;  %s4214_s19 = sshll.u32 %s5761_s3, 4  ;;  %s4215_s19 = int_to_ptr.vmem [resolvable:$true] %s4214_s19 }
0x13b1   :  { %v3380_v33 = vmax.f32 %v3376_v49, 0.0  ;;  %5554 = vmatpush3.msra.mxu0 %v6688_v57  ;;  %s5717_s22 = scalar_lea.vmem %s4215_s19, 4096  ;;  %p5722_p1 = scmp.lt.s32.totalorder %s4215_s19, %s4215_s19 }
0x13b2   :  { %5555 = vmatprep.subr.mxu0 %v6706_v14  ;;  %p5718_p0 = scmp.ne.s32.totalorder %s4215_s19, %s5717_s22  ;;  %p5723_p2 = scmp.lt.s32.totalorder %s5717_s22, %s5717_s22 }
0x13b3   :  { %5528 = vmatprep.mubr.msk.f32.mxu0 %vm89_vm0, %v3380_v33  ;;  %5556 = vmatpush3.msra.mxu0 %v6706_v14 }
0x13b4   :  { %5529 = vmatmul.mubr.msk.f32.gmra.mxu0 %vm89_vm0, %v3381_v0  ;;  %5557 = vmatprep.subr.mxu0 %v6715_v53  ;;  %p5724_p3 = por %p5723_p2, %p5722_p1 }
0x13b5   :  { %5558 = vmatpush3.msra.mxu0 %v6715_v53 }
0x13b6   :  { %5559 = vmatprep.subr.mxu0 %v6722_v54  ;;  %p5725_p4 = pnand %p5724_p3, %p5718_p0 }
0x13b7   :  { %5560 = vmatpush3.msra.mxu0 %v6722_v54 }
0x13b8   :  { %5561 = vmatprep.subr.mxu0 %v6729_v16 }
0x13b9   :  { %5562 = vmatpush3.msra.mxu0 %v6729_v16 }
0x13ba   :  { %5563 = vmatprep.subr.mxu0 %v6736_v37 }
0x13bb   :  { %5564 = vmatpush3.msra.mxu0 %v6736_v37 }
0x13bc   :  { %5565 = vmatprep.subr.mxu0 %v6743_v22 }
0x13bd   :  { %5566 = vmatpush3.msra.mxu0 %v6743_v22 }
0x13be   :  { %5567 = vmatprep.subr.mxu0 %v6750_v38 }
0x13bf   :  { %5568 = vmatpush3.msra.mxu0 %v6750_v38 }
0x13c0   :  { %5597 = vmatprep.subr.mxu0 %v6467_v35 }
0x1470   :  { %v5527_v3 = vpop.f32.mrf.mxu0 }
0x1471   :  { %v3466_v7 = vadd.f32 %v6758_v23, %v5527_v3 }
0x1472   :  { %v3460_v8 = vpop.f32.mrf.mxu0 }
0x1473   :  { %v3461_v9 = vadd.f32 %v6758_v23, %v3460_v8  ;;  %v3480_v26 = vmax.f32 %v3466_v7, 0.0 }
0x1474   :  { %v5530_v11 = vpop.f32.mrf.mxu0 }
0x1475   :  { %v3479_v10 = vmax.f32 %v3461_v9, 0.0  ;;  %v3476_v12 = vadd.f32 %v6758_v23, %v5530_v11 }
0x1476   :  { %v3470_v13 = vpop.f32.mrf.mxu0 }
0x1477   :  { %v3471_v27 = vadd.f32 %v6758_v23, %v3470_v13  ;;  %5547 = vmatprep.mubr.msk.f32.mxu1 %vm89_vm0, %v3479_v10  ;;  %v3482_v51 = vmax.f32 %v3476_v12, 0.0 }
0x1478   :  { %5548 = vmatmul.mubr.msk.f32.vlgmr.msra.gmra.mxu1 %vm89_vm0, %v3480_v26 }
0x1479   :  { %v3481_v28 = vmax.f32 %v3471_v27, 0.0  ;;  %5576 = vmatpush3.msra.mxu1 %v5715_v29 }
0x147a   :  { %5577 = vmatprep.subr.mxu1 %v6480_v1 }
0x147b   :  { %5550 = vmatprep.mubr.msk.f32.mxu1 %vm89_vm0, %v3481_v28  ;;  %5578 = vmatpush3.msra.mxu1 %v6480_v1 }
0x147c   :  { %5551 = vmatmul.mubr.msk.f32.gmra.mxu1 %vm89_vm0, %v3482_v51  ;;  %5579 = vmatprep.subr.mxu1 %v6489_v59 }
0x147d   :  { %5580 = vmatpush3.msra.mxu1 %v6489_v59 }
0x147e   :  { %5581 = vmatprep.subr.mxu1 %v6496_v2 }
0x147f   :  { %5582 = vmatpush3.msra.mxu1 %v6496_v2 }
0x1480   :  { %5583 = vmatprep.subr.mxu1 %v6503_v4 }
0x1481   :  { %5584 = vmatpush3.msra.mxu1 %v6503_v4 }
0x1482   :  { %5585 = vmatprep.subr.mxu1 %v6510_v5 }
0x1483   :  { %5586 = vmatpush3.msra.mxu1 %v6510_v5 }
0x1484   :  { %5587 = vmatprep.subr.mxu1 %v6517_v62 }
0x1485   :  { %5588 = vmatpush3.msra.mxu1 %v6517_v62 }
0x1486   :  { %5589 = vmatprep.subr.mxu1 %v6524_v63 }
0x1487   :  { %5590 = vmatpush3.msra.mxu1 %v6524_v63 }
0x1488   :  { %5607 = vmatprep.subr.mxu1 %v6531_v6 }
0x1538   :  { %v5549_v1 = vpop.f32.mrf.mxu1 }
0x1539   :  { %v3567_v59 = vadd.f32 %v6787_v50, %v5549_v1 }
0x153a   :  { %v3561_v2 = vpop.f32.mrf.mxu1 }
0x153b   :  { %v3562_v4 = vadd.f32 %v6787_v50, %v3561_v2  ;;  %v3581_v24 = vmax.f32 %v3567_v59, 0.0 }
0x153c   :  { %v5552_v39 = vpop.f32.mrf.mxu1 }
0x153d   :  { %v3580_v40 = vmax.f32 %v3562_v4, 0.0  ;;  %v3577_v5 = vadd.f32 %v6787_v50, %v5552_v39 }
0x153e   :  { %v3571_v42 = vpop.f32.mrf.mxu1 }
0x153f   :  { %v3572_v62 = vadd.f32 %v6787_v50, %v3571_v42  ;;  %5569 = vmatprep.mubr.msk.f32.mxu0 %vm89_vm0, %v3580_v40  ;;  %v3583_v6 = vmax.f32 %v3577_v5, 0.0 }
0x1540   :  { %5570 = vmatmul.mubr.msk.f32.vlgmr.msra.gmra.mxu0 %vm89_vm0, %v3581_v24 }
0x1541   :  { %v3582_v63 = vmax.f32 %v3572_v62, 0.0  ;;  %5598 = vmatpush3.msra.mxu0 %v6467_v35  ;;  %v4434_v35 = vld [vmem:[%s7166_s0 + $0xe8] sm:$0xff] }
0x1542   :  { %5599 = vmatprep.subr.mxu0 %v6544_v52 }
0x1543   :  { %5572 = vmatprep.mubr.msk.f32.mxu0 %vm89_vm0, %v3582_v63  ;;  %5600 = vmatpush3.msra.mxu0 %v6544_v52  ;;  %v4435_v52 = vld [vmem:[%s7166_s0 + $0xf0] sm:$0xff] }
0x1544   :  { %5573 = vmatmul.mubr.msk.f32.gmra.mxu0 %vm89_vm0, %v3583_v6  ;;  %5629 = vmatprep.subr.mxu0 %v6553_v34 }
0x1545   :  { %5601 = vmatprep.mubr.msk.f32.mxu0 %vm187_vm1, %v4433_v43 }
0x1548   :  { %5602 = vmatmul.mubr.msk.f32.vlgmr.msra.gmra.mxu0 %vm187_vm1, %v4434_v35 }
0x1549   :  { %5630 = vmatpush3.msra.mxu0 %v6553_v34  ;;  %5604 = vmatprep.mubr.msk.f32.mxu0 %vm187_vm1, %v4435_v52 }
0x154a   :  { %5631 = vmatprep.subr.mxu0 %v6571_v15 }
0x154b   :  { %5632 = vmatpush3.msra.mxu0 %v6571_v15 }
0x154c   :  { %5605 = vmatmul.mubr.msk.f32.gmra.mxu0 %vm187_vm1, %v4436_v44  ;;  %5633 = vmatprep.subr.mxu0 %v6583_v17 }
0x154d   :  { %5634 = vmatpush3.msra.mxu0 %v6583_v17 }
0x154e   :  { %5635 = vmatprep.subr.mxu0 %v6590_v36 }
0x154f   :  { %5636 = vmatpush3.msra.mxu0 %v6590_v36 }
0x1550   :  { %5637 = vmatprep.subr.mxu0 %v6597_v18 }
0x1551   :  { %5638 = vmatpush3.msra.mxu0 %v6597_v18 }
0x1552   :  { %5639 = vmatprep.subr.mxu0 %v6604_v19 }
0x1553   :  { %5640 = vmatpush3.msra.mxu0 %v6604_v19 }
0x1554   :  { %5641 = vmatprep.subr.mxu0 %v6611_v20 }
0x1555   :  { %5642 = vmatpush3.msra.mxu0 %v6611_v20 }
0x1556   :  { %5643 = vmatprep.subr.mxu0 %v6618_v21 }
0x1557   :  { %5644 = vmatpush3.msra.mxu0 %v6618_v21 }
0x1600   :  { %v5571_v34 = vpop.f32.mrf.mxu0 }
0x1601   :  { %v3668_v15 = vadd.f32 %v6836_v41, %v5571_v34 }
0x1602   :  { %v3662_v17 = vpop.f32.mrf.mxu0 }
0x1603   :  { %v3682_v36 = vmax.f32 %v3668_v15, 0.0  ;;  %v3663_v25 = vadd.f32 %v6836_v41, %v3662_v17 }
0x1604   :  { %v5574_v18 = vpop.f32.mrf.mxu0 }
0x1605   :  { %3687 = vst.msk [vmem:[#allocation2 + $0xc8] sm:$0xff] %vm89_vm0, %v3682_v36  ;;  %v3681_v58 = vmax.f32 %v3663_v25, 0.0  ;;  %v3678_v19 = vadd.f32 %v6836_v41, %v5574_v18 }
0x1606   :  { %v3672_v30 = vpop.f32.mrf.mxu0 }
0x1607   :  { %3686 = vst.msk [vmem:[#allocation2 + $0xc0] sm:$0xff] %vm89_vm0, %v3681_v58  ;;  %v3684_v20 = vmax.f32 %v3678_v19, 0.0  ;;  %v3673_v31 = vadd.f32 %v6836_v41, %v3672_v30  ;;  %5591 = vmatprep.mubr.msk.f32.mxu1 %vm89_vm0, %v3681_v58 }
0x1608   :  { %5592 = vmatmul.mubr.msk.f32.vlgmr.msra.gmra.mxu1 %vm89_vm0, %v3682_v36 }
0x1609   :  { %3689 = vst.msk [vmem:[#allocation2 + $0xd8] sm:$0xff] %vm89_vm0, %v3684_v20  ;;  %v3683_v21 = vmax.f32 %v3673_v31, 0.0  ;;  %5608 = vmatpush3.msra.mxu1 %v5716_v32 }
0x160a   :  { %5609 = vmatprep.subr.mxu1 %v6636_v45 }
0x160b   :  { %3688 = vst.msk [vmem:[#allocation2 + $0xd0] sm:$0xff] %vm89_vm0, %v3683_v21  ;;  %5594 = vmatprep.mubr.msk.f32.mxu1 %vm89_vm0, %v3683_v21  ;;  %5610 = vmatpush3.msra.mxu1 %v6636_v45  ;;  %v5603_v45 = vpop.f32.mrf.mxu0 }
0x160c   :  { %5595 = vmatmul.mubr.msk.f32.gmra.mxu1 %vm89_vm0, %v3684_v20  ;;  %5611 = vmatprep.subr.mxu1 %v6646_v61 }
0x160d   :  { %5612 = vmatpush3.msra.mxu1 %v6646_v61  ;;  %v3870_v61 = vpop.f32.mrf.mxu0 }
0x160e   :  { %5613 = vmatprep.subr.mxu1 %v6653_v46 }
0x160f   :  { %5614 = vmatpush3.msra.mxu1 %v6653_v46 }
0x1610   :  { %5615 = vmatprep.subr.mxu1 %v6660_v47 }
0x1611   :  { %5616 = vmatpush3.msra.mxu1 %v6660_v47  ;;  %v5606_v47 = vpop.f32.mrf.mxu0 }
0x1612   :  { %5617 = vmatprep.subr.mxu1 %v6667_v48 }
0x1613   :  { %5618 = vmatpush3.msra.mxu1 %v6667_v48 }
0x1614   :  { %5619 = vmatprep.subr.mxu1 %v6674_v55 }
0x1615   :  { %5620 = vmatpush3.msra.mxu1 %v6674_v55  ;;  %v3880_v55 = vpop.f32.mrf.mxu0 }
0x1616   :  { %5621 = vmatprep.subr.mxu1 %v6681_v56 }
0x1617   :  { %5622 = vmatpush3.msra.mxu1 %v6681_v56 }
0x1618   :  { %5651 = vmatprep.subr.mxu1 %v6688_v57 }
0x16c8   :  { %v5593_v46 = vpop.f32.mrf.mxu1 }
0x16c9   :  { %v3876_v49 = vadd.f32 %v5603_v45, %v5593_v46 }
0x16ca   :  { %v3773_v33 = vpop.f32.mrf.mxu1 }
0x16cb   :  { %v3871_v0 = vadd.f32 %v3870_v61, %v3773_v33  ;;  %v3890_v3 = vadd.f32 %v6694_v60, %v3876_v49 }
0x16cc   :  { %v5596_v48 = vpop.f32.mrf.mxu1 }
0x16cd   :  { %v3889_v7 = vadd.f32 %v6694_v60, %v3871_v0  ;;  %v3886_v8 = vadd.f32 %v5606_v47, %v5596_v48  ;;  %v3894_v56 = vmax.f32 %v3890_v3, 0.0 }
0x16ce   :  { %v3783_v9 = vpop.f32.mrf.mxu1 }
0x16cf   :  { %v3893_v11 = vmax.f32 %v3889_v7, 0.0  ;;  %v3881_v10 = vadd.f32 %v3880_v55, %v3783_v9  ;;  %v3892_v26 = vadd.f32 %v6694_v60, %v3886_v8 }
0x16d1   :  { %v3891_v12 = vadd.f32 %v6694_v60, %v3881_v10  ;;  %5623 = vmatprep.mubr.msk.f32.mxu1 %vm89_vm0, %v3893_v11  ;;  %v3896_v27 = vmax.f32 %v3892_v26, 0.0 }
0x16d2   :  { %5624 = vmatmul.mubr.msk.f32.vlgmr.msra.gmra.mxu1 %vm89_vm0, %v3894_v56 }
0x16d3   :  { %v3895_v13 = vmax.f32 %v3891_v12, 0.0  ;;  %5652 = vmatpush3.msra.mxu1 %v6688_v57 }
0x16d4   :  { %5653 = vmatprep.subr.mxu1 %v6706_v14 }
0x16d5   :  { %5626 = vmatprep.mubr.msk.f32.mxu1 %vm89_vm0, %v3895_v13  ;;  %5654 = vmatpush3.msra.mxu1 %v6706_v14 }
0x16d6   :  { %5627 = vmatmul.mubr.msk.f32.gmra.mxu1 %vm89_vm0, %v3896_v27  ;;  %5655 = vmatprep.subr.mxu1 %v6715_v53 }
0x16d7   :  { %5656 = vmatpush3.msra.mxu1 %v6715_v53 }
0x16d8   :  { %5657 = vmatprep.subr.mxu1 %v6722_v54 }
0x16d9   :  { %5658 = vmatpush3.msra.mxu1 %v6722_v54 }
0x16da   :  { %5659 = vmatprep.subr.mxu1 %v6729_v16 }
0x16db   :  { %5660 = vmatpush3.msra.mxu1 %v6729_v16 }
0x16dc   :  { %5661 = vmatprep.subr.mxu1 %v6736_v37 }
0x16dd   :  { %5662 = vmatpush3.msra.mxu1 %v6736_v37 }
0x16de   :  { %5663 = vmatprep.subr.mxu1 %v6743_v22 }
0x16df   :  { %5664 = vmatpush3.msra.mxu1 %v6743_v22 }
0x16e0   :  { %5665 = vmatprep.subr.mxu1 %v6750_v38 }
0x16e1   :  { %5666 = vmatpush3.msra.mxu1 %v6750_v38 }
0x1792   :  { %v5625_v57 = vpop.f32.mrf.mxu1 }
0x1793   :  { %v3981_v60 = vadd.f32 %v6758_v23, %v5625_v57 }
0x1794   :  { %v3975_v14 = vpop.f32.mrf.mxu1 }
0x1795   :  { %v3976_v53 = vadd.f32 %v6758_v23, %v3975_v14  ;;  %v3995_v28 = vmax.f32 %v3981_v60, 0.0 }
0x1796   :  { %v5628_v54 = vpop.f32.mrf.mxu1 }
0x1797   :  { %v3994_v16 = vmax.f32 %v3976_v53, 0.0  ;;  %v3991_v29 = vadd.f32 %v6758_v23, %v5628_v54 }
0x1798   :  { %v3985_v37 = vpop.f32.mrf.mxu1 }
0x1799   :  { %v3986_v51 = vadd.f32 %v6758_v23, %v3985_v37  ;;  %5645 = vmatprep.mubr.msk.f32.mxu0 %vm89_vm0, %v3994_v16  ;;  %v3997_v38 = vmax.f32 %v3991_v29, 0.0 }
0x179a   :  { %5646 = vmatmul.mubr.msk.f32.vlgmr.msra.gmra.mxu0 %vm89_vm0, %v3995_v28 }
0x179b   :  { %v3996_v22 = vmax.f32 %v3986_v51, 0.0 }
0x179d   :  { %5648 = vmatprep.mubr.msk.f32.mxu0 %vm89_vm0, %v3996_v22 }
0x179e   :  { %5649 = vmatmul.mubr.msk.f32.gmra.mxu0 %vm89_vm0, %v3997_v38 }
0x185a   :  { %v5647_v1 = vpop.f32.mrf.mxu0 }
0x185b   :  { %v4082_v59 = vadd.f32 %v6787_v50, %v5647_v1 }
0x185c   :  { %v4076_v2 = vpop.f32.mrf.mxu0 }
0x185d   :  { %v4077_v4 = vadd.f32 %v6787_v50, %v4076_v2  ;;  %v4096_v24 = vmax.f32 %v4082_v59, 0.0 }
0x185e   :  { %v5650_v39 = vpop.f32.mrf.mxu0 }
0x185f   :  { %v4095_v40 = vmax.f32 %v4077_v4, 0.0  ;;  %v4092_v23 = vadd.f32 %v6787_v50, %v5650_v39 }
0x1860   :  { %v4086_v5 = vpop.f32.mrf.mxu0 }
0x1861   :  { %v4087_v42 = vadd.f32 %v6787_v50, %v4086_v5  ;;  %5667 = vmatprep.mubr.msk.f32.mxu1 %vm89_vm0, %v4095_v40  ;;  %v4098_v63 = vmax.f32 %v4092_v23, 0.0 }
0x1862   :  { %5668 = vmatmul.mubr.msk.f32.vlgmr.msra.gmra.mxu1 %vm89_vm0, %v4096_v24 }
0x1863   :  { %v4097_v62 = vmax.f32 %v4087_v42, 0.0 }
0x1865   :  { %5670 = vmatprep.mubr.msk.f32.mxu1 %vm89_vm0, %v4097_v62 }
0x1866   :  { %5671 = vmatmul.mubr.msk.f32.gmra.mxu1 %vm89_vm0, %v4098_v63 }
0x1922   :  { %v5669_v6 = vpop.f32.mrf.mxu1 }
0x1923   :  { %v4183_v43 = vadd.f32 %v6836_v41, %v5669_v6 }
0x1924   :  { %v4177_v35 = vpop.f32.mrf.mxu1 }
0x1925   :  { %v4197_v52 = vmax.f32 %v4183_v43, 0.0  ;;  %v4178_v44 = vadd.f32 %v6836_v41, %v4177_v35 }
0x1926   :  { %v5672_v34 = vpop.f32.mrf.mxu1 }
0x1927   :  { %4202 = vst.msk [vmem:[#allocation2 + $0xe8] sm:$0xff] %vm89_vm0, %v4197_v52  ;;  %4206 = vst.msk [vmem:[#allocation4 + $0x8] sm:$0xff] %vm89_vm0, %v4197_v52  ;;  %v4196_v50 = vmax.f32 %v4178_v44, 0.0  ;;  %v4193_v15 = vadd.f32 %v6836_v41, %v5672_v34 }
0x1928   :  { %v4187_v17 = vpop.f32.mrf.mxu1 }
0x1929   :  { %4201 = vst.msk [vmem:[#allocation2 + $0xe0] sm:$0xff] %vm89_vm0, %v4196_v50  ;;  %4205 = vst.msk [vmem:[#allocation4] sm:$0xff] %vm89_vm0, %v4196_v50  ;;  %v4199_v36 = vmax.f32 %v4193_v15, 0.0  ;;  %v4188_v25 = vadd.f32 %v6836_v41, %v4187_v17 }
0x192b   :  { %4204 = vst.msk [vmem:[#allocation2 + $0xf8] sm:$0xff] %vm89_vm0, %v4199_v36  ;;  %4208 = vst.msk [vmem:[#allocation4 + $0x18] sm:$0xff] %vm89_vm0, %v4199_v36  ;;  %v4198_v18 = vmax.f32 %v4188_v25, 0.0 }
0x192d   :  { %4203 = vst.msk [vmem:[#allocation2 + $0xf0] sm:$0xff] %vm89_vm0, %v4198_v18  ;;  %4207 = vst.msk [vmem:[#allocation4 + $0x10] sm:$0xff] %vm89_vm0, %v4198_v18 }
0x192e   :  { %5728 = shalt.err (!%p5725_p4)
}
0x192f   :  { %s5763_s23 = smov 128   ;;  %s5764_s24 = smov 8  }
0x1930   :  { %4220 = dma.vmem_to_hbm [thread:$0]  %s4215_s19, 4096, %s7171_s5, [#allocation3], %s5763_s23, %s5763_s23, %s5764_s24  }
0x1931   :  { %s5737_s4 = scalar_lea.vmem %s4227_s21, 512  ;;  %p5742_p6 = scmp.lt.s32.totalorder %s4227_s21, %s4227_s21 }
0x1932   :  { %p5738_p5 = scmp.ne.s32.totalorder %s4227_s21, %s5737_s4  ;;  %p5743_p7 = scmp.lt.s32.totalorder %s5737_s4, %s5737_s4 }
0x1934   :  { %p5744_p8 = por %p5743_p7, %p5742_p6 }
0x1936   :  { %p5745_p9 = pnand %p5744_p8, %p5738_p5 }
0x1938   :  { %5748 = shalt.err (!%p5745_p9)
}
0x1939   :  { %4232 = dma.vmem_to_hbm [thread:$0]  %s4227_s21, 512, %s7172_s6, [#allocation5], %s5763_s23, %s5763_s23, %s5764_s24  }
0x193a   :  { %5757 = dma.done.wait [#allocation3], 4096  }
0x193b   :  { %5758 = vsyncadd [#allocation3], 4294963200 }
0x193c   :  { %5759 = dma.done.wait [#allocation5], 512  }
0x193d   :  { %5760 = vsyncadd [#allocation5], 4294966784 }
0x193e   :  { %4239 = vsyncpa [#allocation3], 1 }
0x193f   :  { %4240 = vsyncpa [#allocation5], 1 }

</bundles_post_ra>
